<compile_context>
chip_gen: v5e
topology: v5e:2x2
jax: 0.10.0
libtpu: 0.0.40
codegen_flags: <defaults>
</compile_context>

<pallas_src>
import jax
import jax.numpy as jnp
import numpy as np
from jax.experimental import pallas as pl
from jax.experimental.pallas import tpu as pltpu


# ------------------------------ kernels --------------------------------------


def _pos_emb_kernel(pos_ref, inv_ref, out_ref):
    """Standard layout. pos_ref: [TR,1] f32, inv_ref: [1,H] f32, out_ref: [TR,2H]."""
    pos = pos_ref[...]                       # [TR, 1]
    inv = inv_ref[...]                       # [1, H]
    sinusoid = pos * inv                     # outer product via broadcast -> [TR, H]
    H = inv_ref.shape[-1]
    odt = out_ref.dtype
    if H >= 128:
        # Two half-row stores: avoids the [TR, 2H] concat temporary (halves
        # vreg pressure) and lets the sin-half store overlap the cos-half VALU
        # work.  Costs at most one masked seam when H % 128 != 0.
        out_ref[:, :H] = jnp.sin(sinusoid).astype(odt)
        out_ref[:, H:] = jnp.cos(sinusoid).astype(odt)
    else:
        # Narrow, non-packable demb: single full-row store.
        out_ref[...] = jnp.concatenate(
            [jnp.sin(sinusoid), jnp.cos(sinusoid)], axis=-1
        ).astype(odt)


def _pos_emb_kernel_packed(pos_ref, inv_ref, out_ref):
    """Lane-dense layout for demb < 128 with 128 % demb == 0.

    pos_ref: [TR, k] f32 (k consecutive positions folded into lanes),
    inv_ref: [1, H] f32, out_ref: [TR, k*demb] with k*demb == 128, so stores
    are full 128-lane (unmasked) instead of masked vst.msk partial stores.
    Row layout: [sin_0, cos_0, sin_1, cos_1, ...] which row-major reshapes back
    to the [S, demb] = [S, sin|cos] layout in the wrapper.
    """
    pos = pos_ref[...]                       # [TR, k]
    inv = inv_ref[...]                       # [1, H]
    H = inv_ref.shape[-1]
    k = out_ref.shape[-1] // (2 * H)
    odt = out_ref.dtype
    pieces = []
    for j in range(k):                       # static unroll (k <= 16)
        s = pos[:, j:j + 1] * inv            # [TR, H]
        pieces.append(jnp.sin(s))
        pieces.append(jnp.cos(s))
    out_ref[...] = jnp.concatenate(pieces, axis=-1).astype(odt)


# ------------------------------ helpers --------------------------------------


def make_inv_freq(demb: int) -> jnp.ndarray:
    # Matches: 1 / 10000 ** (torch.arange(0.0, demb, 2.0) / demb)
    return 1.0 / (10000.0 ** (jnp.arange(0.0, demb, 2.0) / demb))


# Total bytes for the two double-buffered output tiles.  8 MiB fits inside
# every generation's default scoped VMEM (v5e 16 MiB, v6e/v7x 32 MiB scoped)
# with headroom for the tiny pos/inv blocks.
_TILE_BYTES_BUDGET = 8 * 1024 * 1024


def _choose_tile_rows(n_rows: int, row_width: int, itemsize: int) -> int:
    # Byte-based cap (no hard row clamp): each output block is as large as the
    # budget allows, minimizing per-step pipeline overhead for small demb.
    ts = _TILE_BYTES_BUDGET // (2 * row_width * itemsize)
    ts = max(16, (ts // 16) * 16)            # multiple of 16: covers bf16 packing
    return n_rows if n_rows <= ts else ts


def _sanitize_tile_rows(tile: int, n_rows: int, row_width: int, itemsize: int) -> int:
    # User-supplied tiles are rounded to a sublane-friendly multiple of 16 and
    # capped by the VMEM byte budget (a raw tile like 10 would violate the
    # (8,128) divisibility rule and fail Mosaic lowering).
    if tile >= n_rows:
        return n_rows
    tile = max(16, (tile // 16) * 16)
    cap = max(16, ((_TILE_BYTES_BUDGET // (2 * row_width * itemsize)) // 16) * 16)
    tile = min(tile, cap)
    return n_rows if tile >= n_rows else tile


# ------------------------------ wrapper --------------------------------------


def positional_embedding(pos_seq: jnp.ndarray, demb: int, bsz=None, *,
                         out_dtype=jnp.float32,
                         tile_s: int | None = None) -> jnp.ndarray:
    """pos_seq: [S] float array. Returns [S, 1, demb] or [S, bsz, demb].

    out_dtype: output storage dtype (compute stays f32). bf16 halves the HBM
    writeback bytes for transformer consumers.
    """
    assert demb % 2 == 0
    S = int(pos_seq.shape[0])
    H = demb // 2
    itemsize = jnp.dtype(out_dtype).itemsize

    inv2d = make_inv_freq(demb).astype(jnp.float32).reshape(1, H)
    pos_f32 = pos_seq.astype(jnp.float32)

    # Lane-dense packing for small demb: fold k consecutive positions into the
    # lane axis so each output row is exactly 128 lanes wide.
    k = 1
    packed = (demb < 128) and (128 % demb == 0) and (128 // demb <= 16)
    if packed:
        k = 128 // demb
        packed = (S % k == 0)
        if not packed:
            k = 1

    if packed:
        rows, width = S // k, 128
        pos_in = pos_f32.reshape(rows, k)
        kernel = _pos_emb_kernel_packed
        pos_block_last = k
    else:
        rows, width = S, demb
        pos_in = pos_f32.reshape(rows, 1)
        kernel = _pos_emb_kernel
        pos_block_last = 1

    if tile_s is None:
        TR = _choose_tile_rows(rows, width, itemsize)
    else:
        req = max(1, tile_s // k) if packed else max(1, tile_s)
        TR = _sanitize_tile_rows(req, rows, width, itemsize)

    grid = (pl.cdiv(rows, TR),)

    # Advisory cost hint: lets XLA overlap this cheap producer with neighbors.
    cost = pl.CostEstimate(
        flops=15 * S * demb,                 # outer-product mul + sin/cos VALU poly
        transcendentals=S * demb,            # one sin or cos per output element
        bytes_accessed=S * demb * itemsize + S * 4 + H * 4,
    )

    def _build(dim_sem):
        return pl.pallas_call(
            kernel,
            out_shape=jax.ShapeDtypeStruct((rows, width), out_dtype),
            grid=grid,
            in_specs=[
                pl.BlockSpec((TR, pos_block_last), lambda i: (i, 0)),
                pl.BlockSpec((1, H), lambda i: (0, 0)),   # VMEM-resident across steps
            ],
            out_specs=pl.BlockSpec((TR, width), lambda i: (i, 0)),
            compiler_params=pltpu.CompilerParams(
                dimension_semantics=(dim_sem,)),
            cost_estimate=cost,
        )

    try:
        # Real 2-TC split on v7x (independent output tiles per grid step).
        out = _build(pltpu.CORE_PARALLEL)(pos_in, inv2d)
    except Exception:
        # Fallback where CORE_PARALLEL on a plain grid axis is rejected;
        # 1-TC generations (v5e/v6e) lose nothing.
        out = _build(pltpu.PARALLEL)(pos_in, inv2d)

    if packed:
        out = out.reshape(S, demb)           # row-major unfold of the lane packing

    pos_emb = out[:, None, :]                # [S, 1, demb]
    if bsz is not None:
        # Lazy broadcast only; prefer bsz=None downstream to avoid a bsz-times
        # HBM blowup of duplicated data if the consumer materializes it.
        pos_emb = jnp.broadcast_to(pos_emb, (S, bsz, demb))
    return pos_emb


# ------------------------------ reference ------------------------------------


def _reference(pos_seq, demb, bsz=None):
    inv_freq = make_inv_freq(demb).astype(jnp.float32)
    sinusoid = jnp.outer(pos_seq.astype(jnp.float32), inv_freq)
    pos_emb = jnp.concatenate([jnp.sin(sinusoid), jnp.cos(sinusoid)], axis=-1)
    pos_emb = pos_emb[:, None, :]
    if bsz is not None:
        pos_emb = jnp.broadcast_to(pos_emb, (pos_seq.shape[0], bsz, demb))
    return pos_emb


if __name__ == "__main__":
    key = jax.random.PRNGKey(0)

    # --- Case 1: module-scale shapes (seq=8, hidden=32, bsz=2).
    #     demb=32 < 128 -> lane-dense packed path (k=4, 128-wide output rows).
    seq_len, demb, bsz = 8, 32, 2
    base = jnp.arange(seq_len - 1, -1, -1, dtype=jnp.float32)
    jitter = jax.random.uniform(key, (seq_len,), dtype=jnp.float32)
    pos_seq = base + 0.0 * jitter            # exact integer positions, key-derived

    out = jax.block_until_ready(positional_embedding(pos_seq, demb, bsz=bsz))
    np.testing.assert_allclose(np.asarray(out),
                               np.asarray(_reference(pos_seq, demb, bsz=bsz)),
                               rtol=1e-5, atol=1e-5)

    out_none = jax.block_until_ready(positional_embedding(pos_seq, demb))
    assert out_none.shape == (seq_len, 1, demb)
    np.testing.assert_allclose(np.asarray(out_none),
                               np.asarray(_reference(pos_seq, demb)),
                               rtol=1e-5, atol=1e-5)

    # --- Case 2: multi-step grid with a partial last tile, 128-aligned split
    #     stores (demb=256 -> H=128).
    S2, demb2 = 40, 256
    pos_seq2 = jnp.arange(S2 - 1, -1, -1, dtype=jnp.float32)
    out2 = jax.block_until_ready(positional_embedding(pos_seq2, demb2, tile_s=16))
    np.testing.assert_allclose(np.asarray(out2),
                               np.asarray(_reference(pos_seq2, demb2)),
                               rtol=1e-5, atol=1e-5)

    # --- Case 3: bf16 output path + unaligned-seam split stores
    #     (demb=384 -> H=192 >= 128) + 2 grid steps.
    S3, demb3 = 64, 384
    pos_seq3 = jnp.arange(S3 - 1, -1, -1, dtype=jnp.float32)
    out3 = jax.block_until_ready(
        positional_embedding(pos_seq3, demb3, out_dtype=jnp.bfloat16, tile_s=32))
    assert out3.dtype == jnp.bfloat16
    np.testing.assert_allclose(np.asarray(out3, dtype=np.float32),
                               np.asarray(_reference(pos_seq3, demb3)),
                               rtol=1e-2, atol=1e-2)

    # --- Case 4: narrow non-packable demb (96 does not divide 128) -> concat
    #     fallback path.
    S4, demb4 = 24, 96
    pos_seq4 = jnp.arange(S4 - 1, -1, -1, dtype=jnp.float32)
    out4 = jax.block_until_ready(positional_embedding(pos_seq4, demb4))
    np.testing.assert_allclose(np.asarray(out4),
                               np.asarray(_reference(pos_seq4, demb4)),
                               rtol=1e-5, atol=1e-5)

    print("KERNEL_OK")
</pallas_src>

<mosaic_0001>
module attributes {stable_mosaic.version = 11 : i64} {
  func.func @_pos_emb_kernel_packed(%arg0: i32, %arg1: memref<2x4xf32, #tpu.memory_space<vmem>>, %arg2: memref<1x16xf32, #tpu.memory_space<vmem>>, %arg3: memref<2x128xf32, #tpu.memory_space<vmem>>) attributes {dimension_semantics = [#tpu.dimension_semantics<core_parallel>], iteration_bounds = array<i64: 1>, scalar_prefetch = 0 : i64, scratch_operands = 0 : i64, tpu.core_type = #tpu.core_type<tc>, window_params = [{transform_indices = @transform_0, window_bounds = array<i64: 2, 4>}, {pipeline_mode = #tpu.pipeline_mode<synchronous>, transform_indices = @transform_1, window_bounds = array<i64: 1, 16>}, {transform_indices = @transform_2, window_bounds = array<i64: 2, 128>}]} {
    %c0 = arith.constant 0 : index
    %c0_0 = arith.constant 0 : index
    %0 = vector.load %arg1[%c0, %c0_0] : memref<2x4xf32, #tpu.memory_space<vmem>>, vector<2x4xf32>
    %c0_1 = arith.constant 0 : index
    %c0_2 = arith.constant 0 : index
    %1 = vector.load %arg2[%c0_1, %c0_2] : memref<1x16xf32, #tpu.memory_space<vmem>>, vector<1x16xf32>
    %2 = vector.extract_strided_slice %0 {offsets = [0, 0], sizes = [2, 1], strides = [1, 1]} : vector<2x4xf32> to vector<2x1xf32>
    %3 = vector.broadcast %2 : vector<2x1xf32> to vector<2x16xf32>
    %4 = vector.broadcast %1 : vector<1x16xf32> to vector<2x16xf32>
    %5 = arith.mulf %3, %4 : vector<2x16xf32>
    %6 = math.sin %5 : vector<2x16xf32>
    %7 = math.cos %5 : vector<2x16xf32>
    %8 = vector.extract_strided_slice %0 {offsets = [0, 1], sizes = [2, 1], strides = [1, 1]} : vector<2x4xf32> to vector<2x1xf32>
    %9 = vector.broadcast %8 : vector<2x1xf32> to vector<2x16xf32>
    %10 = vector.broadcast %1 : vector<1x16xf32> to vector<2x16xf32>
    %11 = arith.mulf %9, %10 : vector<2x16xf32>
    %12 = math.sin %11 : vector<2x16xf32>
    %13 = math.cos %11 : vector<2x16xf32>
    %14 = vector.extract_strided_slice %0 {offsets = [0, 2], sizes = [2, 1], strides = [1, 1]} : vector<2x4xf32> to vector<2x1xf32>
    %15 = vector.broadcast %14 : vector<2x1xf32> to vector<2x16xf32>
    %16 = vector.broadcast %1 : vector<1x16xf32> to vector<2x16xf32>
    %17 = arith.mulf %15, %16 : vector<2x16xf32>
    %18 = math.sin %17 : vector<2x16xf32>
    %19 = math.cos %17 : vector<2x16xf32>
    %20 = vector.extract_strided_slice %0 {offsets = [0, 3], sizes = [2, 1], strides = [1, 1]} : vector<2x4xf32> to vector<2x1xf32>
    %21 = vector.broadcast %20 : vector<2x1xf32> to vector<2x16xf32>
    %22 = vector.broadcast %1 : vector<1x16xf32> to vector<2x16xf32>
    %23 = arith.mulf %21, %22 : vector<2x16xf32>
    %24 = math.sin %23 : vector<2x16xf32>
    %25 = math.cos %23 : vector<2x16xf32>
    %26 = tpu.concatenate %6, %7, %12, %13, %18, %19, %24, %25 in 1 : vector<2x16xf32>, vector<2x16xf32>, vector<2x16xf32>, vector<2x16xf32>, vector<2x16xf32>, vector<2x16xf32>, vector<2x16xf32>, vector<2x16xf32> -> vector<2x128xf32>
    %c0_3 = arith.constant 0 : index
    %c0_4 = arith.constant 0 : index
    %27 = vector.load %arg3[%c0_3, %c0_4] : memref<2x128xf32, #tpu.memory_space<vmem>>, vector<2x128xf32>
    tpu.vector_store %arg3[%c0_3, %c0_4], %26 {strides = array<i32>} : memref<2x128xf32, #tpu.memory_space<vmem>>, vector<2x128xf32>,
    return
  }
  func.func @transform_0(%arg0: i32) -> (i32, i32) {
    %c0_i32 = arith.constant 0 : i32
    %c0_i32_0 = arith.constant 0 : i32
    return %arg0, %c0_i32 : i32, i32
  }
  func.func @transform_1(%arg0: i32) -> (i32, i32) {
    %c0_i32 = arith.constant 0 : i32
    %c0_i32_0 = arith.constant 0 : i32
    %c0_i32_1 = arith.constant 0 : i32
    return %c0_i32, %c0_i32_0 : i32, i32
  }
  func.func @transform_2(%arg0: i32) -> (i32, i32) {
    %c0_i32 = arith.constant 0 : i32
    %c0_i32_0 = arith.constant 0 : i32
    return %arg0, %c0_i32 : i32, i32
  }
}

module attributes {stable_mosaic.version = 11 : i64} {
  func.func @_pos_emb_kernel_packed(%arg0: i32, %arg1: memref<2x4xf32, #tpu.memory_space<vmem>>, %arg2: memref<1x16xf32, #tpu.memory_space<vmem>>, %arg3: memref<2x128xf32, #tpu.memory_space<vmem>>) attributes {dimension_semantics = [#tpu.dimension_semantics<parallel>], iteration_bounds = array<i64: 1>, scalar_prefetch = 0 : i64, scratch_operands = 0 : i64, tpu.core_type = #tpu.core_type<tc>, window_params = [{transform_indices = @transform_0, window_bounds = array<i64: 2, 4>}, {pipeline_mode = #tpu.pipeline_mode<synchronous>, transform_indices = @transform_1, window_bounds = array<i64: 1, 16>}, {transform_indices = @transform_2, window_bounds = array<i64: 2, 128>}]} {
    %c0 = arith.constant 0 : index
    %c0_0 = arith.constant 0 : index
    %0 = vector.load %arg1[%c0, %c0_0] : memref<2x4xf32, #tpu.memory_space<vmem>>, vector<2x4xf32>
    %c0_1 = arith.constant 0 : index
    %c0_2 = arith.constant 0 : index
    %1 = vector.load %arg2[%c0_1, %c0_2] : memref<1x16xf32, #tpu.memory_space<vmem>>, vector<1x16xf32>
    %2 = vector.extract_strided_slice %0 {offsets = [0, 0], sizes = [2, 1], strides = [1, 1]} : vector<2x4xf32> to vector<2x1xf32>
    %3 = vector.broadcast %2 : vector<2x1xf32> to vector<2x16xf32>
    %4 = vector.broadcast %1 : vector<1x16xf32> to vector<2x16xf32>
    %5 = arith.mulf %3, %4 : vector<2x16xf32>
    %6 = math.sin %5 : vector<2x16xf32>
    %7 = math.cos %5 : vector<2x16xf32>
    %8 = vector.extract_strided_slice %0 {offsets = [0, 1], sizes = [2, 1], strides = [1, 1]} : vector<2x4xf32> to vector<2x1xf32>
    %9 = vector.broadcast %8 : vector<2x1xf32> to vector<2x16xf32>
    %10 = vector.broadcast %1 : vector<1x16xf32> to vector<2x16xf32>
    %11 = arith.mulf %9, %10 : vector<2x16xf32>
    %12 = math.sin %11 : vector<2x16xf32>
    %13 = math.cos %11 : vector<2x16xf32>
    %14 = vector.extract_strided_slice %0 {offsets = [0, 2], sizes = [2, 1], strides = [1, 1]} : vector<2x4xf32> to vector<2x1xf32>
    %15 = vector.broadcast %14 : vector<2x1xf32> to vector<2x16xf32>
    %16 = vector.broadcast %1 : vector<1x16xf32> to vector<2x16xf32>
    %17 = arith.mulf %15, %16 : vector<2x16xf32>
    %18 = math.sin %17 : vector<2x16xf32>
    %19 = math.cos %17 : vector<2x16xf32>
    %20 = vector.extract_strided_slice %0 {offsets = [0, 3], sizes = [2, 1], strides = [1, 1]} : vector<2x4xf32> to vector<2x1xf32>
    %21 = vector.broadcast %20 : vector<2x1xf32> to vector<2x16xf32>
    %22 = vector.broadcast %1 : vector<1x16xf32> to vector<2x16xf32>
    %23 = arith.mulf %21, %22 : vector<2x16xf32>
    %24 = math.sin %23 : vector<2x16xf32>
    %25 = math.cos %23 : vector<2x16xf32>
    %26 = tpu.concatenate %6, %7, %12, %13, %18, %19, %24, %25 in 1 : vector<2x16xf32>, vector<2x16xf32>, vector<2x16xf32>, vector<2x16xf32>, vector<2x16xf32>, vector<2x16xf32>, vector<2x16xf32>, vector<2x16xf32> -> vector<2x128xf32>
    %c0_3 = arith.constant 0 : index
    %c0_4 = arith.constant 0 : index
    %27 = vector.load %arg3[%c0_3, %c0_4] : memref<2x128xf32, #tpu.memory_space<vmem>>, vector<2x128xf32>
    tpu.vector_store %arg3[%c0_3, %c0_4], %26 {strides = array<i32>} : memref<2x128xf32, #tpu.memory_space<vmem>>, vector<2x128xf32>,
    return
  }
  func.func @transform_0(%arg0: i32) -> (i32, i32) {
    %c0_i32 = arith.constant 0 : i32
    %c0_i32_0 = arith.constant 0 : i32
    return %arg0, %c0_i32 : i32, i32
  }
  func.func @transform_1(%arg0: i32) -> (i32, i32) {
    %c0_i32 = arith.constant 0 : i32
    %c0_i32_0 = arith.constant 0 : i32
    %c0_i32_1 = arith.constant 0 : i32
    return %c0_i32, %c0_i32_0 : i32, i32
  }
  func.func @transform_2(%arg0: i32) -> (i32, i32) {
    %c0_i32 = arith.constant 0 : i32
    %c0_i32_0 = arith.constant 0 : i32
    return %arg0, %c0_i32 : i32, i32
  }
}

</mosaic_0001>

<bundles_post_ra>
// kernel: tpu_custom_call.1
= control target key start
LH: loop header
LB: loop body
LE: loop exit
PB: predicated region body
PF: predicated region fallthrough
CT: control target
= control target key end

     0   :  { %s1536_s9 = sld [smem:[#allocation0]]   ;;  %s2163_s0 = inlined_call_operand.hbm [shape: f32[2,4], index: 0, kind: input, shape index: {}]   ;;  %s2164_s1 = inlined_call_operand.hbm [shape: f32[1,16], index: 1, kind: input, shape index: {}]   ;;  %s2165_s2 = inlined_call_operand.hbm [shape: f32[2,128], index: 2, kind: output, shape index: {}]  }
   0x1   :  { %7 = vsyncpa [#allocation3], 0 }
   0x2   :  { %8 = vsyncpa [#allocation6], 0 }
   0x3   :  { %9 = vsyncpa [#allocation4], 0  ;;  %s1501_s14 = smov [#allocation2]   ;;  %s28_s19 = sshll.u32 %s2164_s1, 4  ;;  %s29_s19 = int_to_ptr.hbm [resolvable:$true] %s28_s19 }
   0x4   :  { %s19_s15 = sshll.u32 %s1501_s14, 4  ;;  %s1427_s24 = scalar_lea.hbm %s2163_s0, 2  ;;  %s20_s15 = int_to_ptr.vmem [resolvable:$true] %s19_s15 }
   0x6   :  { %s1371_s10 = sshll.u32 %s1536_s9, 1 }
   0x7   :  { %s15_s13 = scalar_lea.hbm %s2163_s0, %s1371_s10 }
   0x8   :  { %s17_s16 = sshll.u32 %s15_s13, 4  ;;  %s18_s16 = int_to_ptr.hbm [resolvable:$true] %s17_s16 }
   0x9   :  { %s1423_s20 = sshra.s32 %s18_s16, 4  ;;  %s1424_s20 = int_to_ptr.hbm [resolvable:$true] %s1423_s20 }
   0xa   :  { %s1425_s21 = scalar_lea.hbm %s1424_s20, 2 }
   0xb   :  { %p1426_p0 = scmp.ne.s32.totalorder %s1424_s20, %s1425_s21  ;;  %p1429_p1 = scmp.lt.s32.totalorder %s1427_s24, %s1425_s21 }
   0xd   :  { %p1431_p2 = pnand %p1429_p1, %p1426_p0 }
   0xf   :  { %1434 = shalt.err (!%p1431_p2)
}
  0x10   :  { %22 = dma.hbm_to_vmem [thread:$0]  %s18_s16, 32, %s20_s15, [#allocation3]  }
  0x11   :  { %s1502_s25 = smov [#allocation5]  }
  0x12   :  { %s30_s26 = sshll.u32 %s1502_s25, 4  ;;  %s31_s26 = int_to_ptr.vmem [resolvable:$true] %s30_s26 }
  0x13   :  { %33 = dma.hbm_to_vmem [thread:$0]  %s29_s19, 16, %s31_s26, [#allocation6]  }
  0x14   :  { %1495 = dma.done.wait [#allocation3], 32  }
  0x15   :  { %1496 = vsyncadd [#allocation3], 4294967264 }
  0x16   :  { %1497 = dma.done.wait [#allocation6], 16  }
  0x17   :  { %1498 = vsyncadd [#allocation6], 4294967280  ;;  %v1503_v0 = vmov 2   ;;  %v1504_v1 = vmov 0   ;;  %v42_v2 = vld [vmem:[#allocation2] sm:$0x3]  ;;  %s1352_s6 = scalar_lea.hbm %s2165_s2, %s1371_s10 }
  0x18   :  { %1419 = vset.pattern.permute.xlu1 %v1503_v0  ;;  %1417 = vset.pattern.permute.xlu0 %v1504_v1  ;;  %v1505_v3 = vmov 3   ;;  %v1506_v4 = vmov 1   ;;  %v1422_v5 = vld [vmem:[#allocation5] ss:$0 sm:$0xff]  ;;  %v1507_v34 = vmov 920167782  }
  0x19   :  { %677 = vperm.xlu1 %1419, %v42_v2   ;;  %46 = vperm.xlu0 %1417, %v42_v2   ;;  %v1508_v36 = vmov 1326507024   ;;  %v1509_v38 = vmov 2102212464   ;;  %v1510_v43 = vmov 2475754826  }
  0x1a   :  { %v1511_v45 = vmov 2131351028   ;;  %v1512_v53 = vmov 683565275   ;;  %s1513_s0 = smov 80   ;;  %s1514_s1 = smov 16  }
  0x1b   :  { %s1515_s27 = smov 48   ;;  %s1516_s28 = smov 32  }
  0x1c   :  { %s1517_s29 = smov 64   ;;  %s1518_s30 = smov 96  }
  0x1d   :  { %s1519_s3 = smov 112   ;;  %s1520_s7 = smov [#allocation7]  }
  0x1e   :  { %s1354_s8 = sshll.u32 %s1520_s7, 4  ;;  %s1356_s11 = sshll.u32 %s1352_s6, 4  ;;  %s1355_s8 = int_to_ptr.vmem [resolvable:$true] %s1354_s8  ;;  %s1357_s11 = int_to_ptr.hbm [resolvable:$true] %s1356_s11 }
  0x1f   :  { %s1483_s9 = sshra.s32 %s1357_s11, 4  ;;  %s1487_s14 = scalar_lea.hbm %s2165_s2, 2  ;;  %s1484_s9 = int_to_ptr.hbm [resolvable:$true] %s1483_s9 }
  0x20   :  { %s1485_s12 = scalar_lea.hbm %s1484_s9, 2 }
  0x21   :  { %1420 = vset.pattern.permute.xlu1 %v1505_v3  ;;  %1418 = vset.pattern.permute.xlu0 %v1506_v4  ;;  %p1486_p3 = scmp.ne.s32.totalorder %s1484_s9, %s1485_s12  ;;  %p1489_p4 = scmp.lt.s32.totalorder %s1487_s14, %s1485_s12 }
  0x22   :  { %991 = vperm.xlu1 %1420, %v42_v2   ;;  %363 = vperm.xlu0 %1418, %v42_v2  }
  0x23   :  { %p1491_p5 = pnand %p1489_p4, %p1486_p3 }
  0x2a   :  { %1421 = vset.pattern.permute.xlu0 %v1505_v3 }
  0x8b   :  { %v678_v6 = vpop.permute.xlu1 %677  ;;  %v47_v7 = vpop.permute.xlu0 %46 }
  0x8c   :  { %v1551_v8 = vmul.f32 %v1422_v5, %v678_v6  ;;  %v1553_v9 = vmul.f32 %v1422_v5, %v47_v7 }
  0x8e   :  { %v684_v10 = vand.u32 2139095040, %v1551_v8  ;;  %v56_v11 = vand.u32 2139095040, %v1553_v9  ;;  %v681_v14 = vand.u32 2147483647, %v1551_v8  ;;  %v2168_v23 = vand.u32 2147483647, %v1553_v9 }
  0x90   :  { %v685_v12 = vshrl.u32 %v684_v10, 23  ;;  %v57_v13 = vshrl.u32 %v56_v11, 23  ;;  %v688_v18 = vand.u32 8388607, %v681_v14  ;;  %v1567_v28 = vand.u32 8388607, %v2168_v23 }
  0x92   :  { %v1384_v15 = vadd.s32 4294967169, %v685_v12  ;;  %v1372_v16 = vadd.s32 4294967169, %v57_v13  ;;  %v689_v24 = vor.u32 8388608, %v688_v18  ;;  %v61_v42 = vor.u32 8388608, %v1567_v28 }
  0x94   :  { %v691_v17 = vadd.s32 1, %v1384_v15  ;;  %v63_v19 = vadd.s32 1, %v1372_v16  ;;  %v992_v21 = vpop.permute.xlu1 %991  ;;  %v364_v27 = vpop.permute.xlu0 %363  ;;  %v1569_v29 = vshll.u32 %v689_v24, 8 }
  0x95   :  { %v1561_v25 = vmul.f32 %v1422_v5, %v992_v21  ;;  %v1572_v32 = vmul.f32 %v1422_v5, %v364_v27 }
  0x96   :  { %vm692_vm0 = vcmp.gt.s32.totalorder %v691_v17, 0  ;;  %vm64_vm1 = vcmp.gt.s32.totalorder %v63_v19, 0  ;;  %v1588_v47 = vand.u32 65535, %v1569_v29  ;;  %v1604_v61 = vshrl.u32 %v1569_v29, 16 }
  0x97   :  { %v693_v20 = vsel %vm692_vm0, %v691_v17, 0  ;;  %v65_v30 = vsel %vm64_vm1, %v63_v19, 0  ;;  %v998_v31 = vand.u32 2139095040, %v1561_v25  ;;  %v2166_v48 = vand.u32 2147483647, %v1561_v25 }
  0x98   :  { %v695_v22 = vand.u32 31, %v693_v20  ;;  %v1574_v33 = vshrl.u32 %v693_v20, 5  ;;  %v1582_v41 = vand.u32 31, %v65_v30  ;;  %v370_v52 = vand.u32 2139095040, %v1572_v32 }
  0x99   :  { %v999_v51 = vshrl.u32 %v998_v31, 23  ;;  %v1606_v62 = vshrl.u32 %v65_v30, 5  ;;  %v1002_v63 = vand.u32 8388607, %v2166_v48  ;;  %v2167_v0 = vand.u32 2147483647, %v1572_v32 }
  0x9a   :  { %v1563_v26 = vsub.s32 32, %v695_v22  ;;  %v710_v35 = vshll.u32 %v1507_v34, %v695_v22  ;;  %v707_v39 = vshll.u32 %v1509_v38, %v695_v22  ;;  %v701_v44 = vshll.u32 %v1510_v43, %v695_v22 }
  0x9b   :  { %v704_v46 = vshll.u32 %v1511_v45, %v695_v22  ;;  %v698_v54 = vshll.u32 %v1512_v53, %v695_v22  ;;  %vm716_vm2 = vcmp.lt.s32.totalorder %v1574_v33, 4  ;;  %v1601_v58 = vsub.s32 32, %v1582_v41 }
  0x9c   :  { %v711_v37 = vshrl.u32 %v1508_v36, %v1563_v26  ;;  %v708_v40 = vshrl.u32 %v1507_v34, %v1563_v26  ;;  %v702_v49 = vshrl.u32 %v1511_v45, %v1563_v26  ;;  %v705_v50 = vshrl.u32 %v1509_v38, %v1563_v26 }
  0x9d   :  { %v699_v55 = vshrl.u32 %v1510_v43, %v1563_v26  ;;  %v1390_v59 = vadd.s32 4294967169, %v999_v51  ;;  %v371_v60 = vshrl.u32 %v370_v52, 23  ;;  %vm713_vm3 = vcmp.lt.s32.totalorder %v1574_v33, 1 }
  0x9e   :  { %v712_v56 = vor.u32 %v711_v37, %v710_v35  ;;  %v709_v57 = vor.u32 %v708_v40, %v707_v39  ;;  %v1611_v2 = vor.u32 %v702_v49, %v701_v44  ;;  %v706_v3 = vor.u32 %v705_v50, %v704_v46 }
  0x9f   :  { %v1005_v4 = vadd.s32 1, %v1390_v59  ;;  %v1378_v5 = vadd.s32 4294967169, %v371_v60  ;;  %v700_v6 = vor.u32 %v699_v55, %v698_v54  ;;  %vm715_vm4 = vcmp.lt.s32.totalorder %v1574_v33, 3 }
  0xa0   :  { %v726_v7 = vsel %vm716_vm2, %v712_v56, 1326507024  ;;  %v722_v10 = vsel %vm716_vm2, %v709_v57, 920167782  ;;  %v80_v11 = vshrl.u32 %v1507_v34, %v1601_v58  ;;  %v79_v13 = vshll.u32 %v1509_v38, %v1582_v41 }
  0xa1   :  { %vm1006_vm5 = vcmp.gt.s32.totalorder %v1005_v4, 0  ;;  %v377_v12 = vadd.s32 1, %v1378_v5  ;;  %v82_v15 = vshll.u32 %v1507_v34, %v1582_v41  ;;  %v83_v16 = vshrl.u32 %v1508_v36, %v1601_v58 }
  0xa2   :  { %v1007_v17 = vsel %vm1006_vm5, %v1005_v4, 0  ;;  %v725_v18 = vsel %vm713_vm3, %v1611_v2, %v706_v3  ;;  %v727_v19 = vsel %vm715_vm4, %v709_v57, %v726_v7  ;;  %vm714_vm6 = vcmp.lt.s32.totalorder %v1574_v33, 2 }
  0xa3   :  { %v1009_v20 = vand.u32 31, %v1007_v17  ;;  %v721_v21 = vsel %vm713_vm3, %v700_v6, %v1611_v2  ;;  %v723_v22 = vsel %vm715_vm4, %v706_v3, %v722_v10  ;;  %vm88_vm7 = vcmp.lt.s32.totalorder %v1606_v62, 4 }
  0xa4   :  { %vm378_vm8 = vcmp.gt.s32.totalorder %v377_v12, 0  ;;  %v1639_v24 = vor.u32 %v80_v11, %v79_v13  ;;  %v1003_v27 = vor.u32 8388608, %v1002_v63  ;;  %v374_v31 = vand.u32 8388607, %v2167_v0 }
  0xa5   :  { %v1010_v30 = vsub.s32 32, %v1009_v20  ;;  %v1643_v35 = vshrl.u32 %v1007_v17, 5  ;;  %v1024_v37 = vshll.u32 %v1507_v34, %v1009_v20  ;;  %v697_v39 = vshrl.u32 %v1512_v53, %v1563_v26 }
  0xa6   :  { %v728_v40 = vsel %vm714_vm6, %v725_v18, %v727_v19  ;;  %v1015_v44 = vshll.u32 %v1510_v43, %v1009_v20  ;;  %v1018_v46 = vshll.u32 %v1511_v45, %v1009_v20  ;;  %v379_v50 = vsel %vm378_vm8, %v377_v12, 0 }
  0xa7   :  { %v1019_v49 = vshrl.u32 %v1509_v38, %v1010_v30  ;;  %v1016_v51 = vshrl.u32 %v1511_v45, %v1010_v30  ;;  %v1021_v52 = vshll.u32 %v1509_v38, %v1009_v20  ;;  %v1022_v54 = vshrl.u32 %v1507_v34, %v1010_v30 }
  0xa8   :  { %v1025_v55 = vshrl.u32 %v1508_v36, %v1010_v30  ;;  %v84_v56 = vor.u32 %v83_v16, %v82_v15  ;;  %v1660_v26 = vsel %vm88_vm7, %v1639_v24, 920167782  ;;  %v375_v57 = vor.u32 8388608, %v374_v31 }
  0xa9   :  { %v733_v59 = vshrl.u32 %v728_v40, 16  ;;  %v1012_v60 = vshll.u32 %v1512_v53, %v1009_v20  ;;  %v1013_v63 = vshrl.u32 %v1510_v43, %v1010_v30  ;;  %vm1030_vm9 = vcmp.lt.s32.totalorder %v1643_v35, 4 }
  0xaa   :  { %v1026_v4 = vor.u32 %v1025_v55, %v1024_v37  ;;  %v1020_v5 = vor.u32 %v1019_v49, %v1018_v46  ;;  %v1665_v7 = vshll.u32 %v1003_v27, 8  ;;  %v381_v10 = vand.u32 31, %v379_v50 }
  0xab   :  { %v718_v11 = vsel %vm716_vm2, %v706_v3, 2102212464  ;;  %v1017_v12 = vor.u32 %v1016_v51, %v1015_v44  ;;  %v1023_v13 = vor.u32 %v1022_v54, %v1021_v52  ;;  %v717_v15 = vsel %vm713_vm3, %v697_v39, %v700_v6 }
  0xac   :  { %v1673_v16 = vsel %vm714_vm6, %v721_v21, %v723_v22  ;;  %vm1027_vm10 = vcmp.lt.s32.totalorder %v1643_v35, 1  ;;  %vm1029_vm11 = vcmp.lt.s32.totalorder %v1643_v35, 3  ;;  %v1040_v17 = vsel %vm1030_vm9, %v1026_v4, 1326507024 }
  0xad   :  { %v1679_v18 = vshll.u32 %v375_v57, 8  ;;  %v1011_v3 = vshrl.u32 %v1512_v53, %v1010_v30  ;;  %v1014_v19 = vor.u32 %v1013_v63, %v1012_v60  ;;  %v719_v6 = vsel %vm715_vm4, %v1611_v2, %v718_v11 }
  0xae   :  { %v1686_v20 = vmul.u32 %v733_v59, %v1588_v47  ;;  %v1690_v21 = vsel %vm88_vm7, %v84_v56, 1326507024  ;;  %v1032_v22 = vsel %vm1030_vm9, %v1020_v5, 2102212464  ;;  %v1694_v27 = vsub.s32 32, %v381_v10 }
  0xaf   :  { %v732_v31 = vand.u32 65535, %v728_v40  ;;  %vm1028_vm12 = vcmp.lt.s32.totalorder %v1643_v35, 2  ;;  %v1036_v30 = vsel %vm1030_vm9, %v1023_v13, 920167782  ;;  %v1039_v2 = vsel %vm1027_vm10, %v1017_v12, %v1020_v5 }
  0xb0   :  { %v1041_v37 = vsel %vm1029_vm11, %v1023_v13, %v1040_v17  ;;  %v1704_v39 = vand.u32 65535, %v1665_v7  ;;  %v1707_v44 = vshrl.u32 %v1665_v7, 16  ;;  %v1711_v40 = vsel %vm714_vm6, %v717_v15, %v719_v6 }
  0xb1   :  { %v754_v46 = vand.u32 65535, %v1673_v16  ;;  %v1031_v49 = vsel %vm1027_vm10, %v1011_v3, %v1014_v19  ;;  %v1033_v51 = vsel %vm1029_vm11, %v1017_v12, %v1032_v22  ;;  %v1719_v52 = vand.u32 65535, %v1679_v18 }
  0xb2   :  { %v738_v54 = vshll.u32 %v1686_v20, 16  ;;  %v1035_v55 = vsel %vm1027_vm10, %v1014_v19, %v1017_v12  ;;  %v1037_v33 = vsel %vm1029_vm11, %v1020_v5, %v1036_v30  ;;  %v1728_v56 = vsel %vm1028_vm12, %v1039_v2, %v1041_v37 }
  0xb3   :  { %v385_v57 = vshrl.u32 %v1510_v43, %v1694_v27  ;;  %v1733_v60 = vshrl.u32 %v1679_v18, 16  ;;  %v734_v63 = vmul.u32 %v732_v31, %v1588_v47  ;;  %v1737_v4 = vmul.u32 %v732_v31, %v1604_v61 }
  0xb4   :  { %v737_v11 = vmul.u32 %v733_v59, %v1604_v61  ;;  %v1742_v5 = vsel %vm1028_vm12, %v1031_v49, %v1033_v51  ;;  %v1744_v12 = vshrl.u32 %v379_v50, 5  ;;  %v384_v13 = vshll.u32 %v1512_v53, %v381_v10 }
  0xb5   :  { %v388_v15 = vshrl.u32 %v1511_v45, %v1694_v27  ;;  %v1751_v17 = vsel %vm1028_vm12, %v1035_v55, %v1037_v33  ;;  %v1046_v3 = vand.u32 65535, %v1728_v56  ;;  %v1047_v19 = vshrl.u32 %v1728_v56, 16 }
  0xb6   :  { %v391_v59 = vshrl.u32 %v1509_v38, %v1694_v27  ;;  %v1757_v6 = vor.u32 %v385_v57, %v384_v13  ;;  %v387_v50 = vshll.u32 %v1510_v43, %v381_v10  ;;  %v394_v22 = vshrl.u32 %v1507_v34, %v1694_v27 }
  0xb7   :  { %vm742_vm13 = vc.u32 %v734_v63, %v738_v54  ;;  %v390_v31 = vshll.u32 %v1511_v45, %v381_v10  ;;  %v740_v35 = vshll.u32 %v1737_v4, 16  ;;  %v744_v2 = vadd.s32 %v738_v54, %v734_v63 }
  0xb8   :  { %v743_v30 = vsel %vm742_vm13, 1, %v1504_v1  ;;  %v1765_v37 = vor.u32 %v388_v15, %v387_v50  ;;  %v393_v49 = vshll.u32 %v1509_v38, %v381_v10  ;;  %v755_v55 = vshrl.u32 %v1673_v16, 16 }
  0xb9   :  { %v745_v51 = vadd.s32 %v743_v30, %v737_v11  ;;  %v1769_v33 = vor.u32 %v391_v59, %v390_v31  ;;  %v396_v57 = vshll.u32 %v1507_v34, %v381_v10  ;;  %v397_v13 = vshrl.u32 %v1508_v36, %v1694_v27 }
  0xba   :  { %vm746_vm14 = vc.u32 %v744_v2, %v740_v35  ;;  %v1774_v48 = vor.u32 %v394_v22, %v393_v49  ;;  %v757_v54 = vmul.u32 %v755_v55, %v1588_v47  ;;  %v758_v63 = vmul.u32 %v754_v46, %v1604_v61 }
  0xbb   :  { %v747_v0 = vsel %vm746_vm14, 1, %v1504_v1  ;;  %v739_v11 = vshrl.u32 %v1686_v20, 16  ;;  %v70_v16 = vshll.u32 %v1512_v53, %v1582_v41  ;;  %v71_v34 = vshrl.u32 %v1510_v43, %v1601_v58 }
  0xbc   :  { %v749_v15 = vadd.s32 %v747_v0, %v745_v51  ;;  %v756_v36 = vmul.u32 %v754_v46, %v1588_v47  ;;  %v760_v10 = vshll.u32 %v757_v54, 16  ;;  %v73_v59 = vshll.u32 %v1510_v43, %v1582_v41 }
  0xbd   :  { %v74_v50 = vshrl.u32 %v1511_v45, %v1601_v58  ;;  %vm402_vm15 = vcmp.lt.s32.totalorder %v1744_v12, 4  ;;  %v759_v20 = vmul.u32 %v755_v55, %v1604_v61  ;;  %v1791_v0 = vor.u32 %v71_v34, %v70_v16 }
  0xbe   :  { %v76_v22 = vshll.u32 %v1511_v45, %v1582_v41  ;;  %v77_v31 = vshrl.u32 %v1509_v38, %v1601_v58  ;;  %vm399_vm0 = vcmp.lt.s32.totalorder %v1744_v12, 1  ;;  %v762_v47 = vshll.u32 %v758_v63, 16 }
  0xbf   :  { %vm764_vm1 = vc.u32 %v756_v36, %v760_v10  ;;  %v766_v43 = vadd.s32 %v760_v10, %v756_v36  ;;  %v1798_v46 = vor.u32 %v74_v50, %v73_v59  ;;  %v398_v35 = vor.u32 %v397_v13, %v396_v57 }
  0xc0   :  { %v750_v30 = vadd.s32 %v749_v15, %v739_v11  ;;  %v765_v2 = vsel %vm764_vm1, 1, %v1504_v1  ;;  %v1801_v61 = vor.u32 %v77_v31, %v76_v22  ;;  %vm85_vm3 = vcmp.lt.s32.totalorder %v1606_v62, 1 }
  0xc1   :  { %v767_v49 = vadd.s32 %v765_v2, %v759_v20  ;;  %vm768_vm2 = vc.u32 %v766_v43, %v762_v47  ;;  %vm87_vm4 = vcmp.lt.s32.totalorder %v1606_v62, 3  ;;  %v741_v38 = vshrl.u32 %v1737_v4, 16 }
  0xc2   :  { %v769_v41 = vsel %vm768_vm2, 1, %v1504_v1  ;;  %v93_v45 = vsel %vm85_vm3, %v1791_v0, %v1798_v46  ;;  %v95_v51 = vsel %vm87_vm4, %v1801_v61, %v1660_v26  ;;  %v761_v55 = vshrl.u32 %v757_v54, 16 }
  0xc3   :  { %v763_v57 = vshrl.u32 %v758_v63, 16  ;;  %v771_v13 = vadd.s32 %v769_v41, %v767_v49  ;;  %vm86_vm5 = vcmp.lt.s32.totalorder %v1606_v62, 2  ;;  %v1816_v11 = vadd.s32 %v750_v30, %v741_v38 }
  0xc4   :  { %v96_v4 = vsel %vm86_vm5, %v93_v45, %v95_v51  ;;  %v97_v15 = vsel %vm85_vm3, %v1798_v46, %v1801_v61  ;;  %v99_v26 = vsel %vm87_vm4, %v1639_v24, %v1690_v21  ;;  %v1828_v54 = vadd.s32 %v766_v43, %v762_v47 }
  0xc5   :  { %v772_v63 = vadd.s32 %v771_v13, %v761_v55  ;;  %v100_v16 = vsel %vm86_vm5, %v97_v15, %v99_v26  ;;  %v1834_v34 = vshll.u32 %v61_v42, 8  ;;  %v126_v59 = vand.u32 65535, %v96_v4 }
  0xc6   :  { %v104_v36 = vand.u32 65535, %v100_v16  ;;  %v105_v10 = vshrl.u32 %v100_v16, 16  ;;  %v127_v50 = vshrl.u32 %v96_v4, 16  ;;  %v408_v20 = vsel %vm402_vm15, %v1774_v48, 920167782 }
  0xc7   :  { %v773_v22 = vadd.s32 %v772_v63, %v763_v57  ;;  %v102_v24 = vand.u32 65535, %v1834_v34  ;;  %v103_v21 = vshrl.u32 %v1834_v34, 16  ;;  %vm401_vm6 = vcmp.lt.s32.totalorder %v1744_v12, 3 }
  0xc8   :  { %v407_v28 = vsel %vm399_vm0, %v1757_v6, %v1765_v37  ;;  %v412_v42 = vsel %vm402_vm15, %v398_v35, 1326507024  ;;  %vm776_vm8 = vc.u32 %v1816_v11, %v1828_v54  ;;  %v411_v31 = vsel %vm399_vm0, %v1765_v37, %v1769_v33 }
  0xc9   :  { %v777_v47 = vadd.s32 1, %v773_v22  ;;  %v107_v43 = vmul.u32 %v105_v10, %v102_v24  ;;  %v108_v30 = vmul.u32 %v104_v36, %v103_v21  ;;  %v409_v2 = vsel %vm401_vm6, %v1769_v33, %v408_v20 }
  0xca   :  { %v774_v49 = vmul.u32 %v1569_v29, %v1711_v40  ;;  %v129_v38 = vmul.u32 %v127_v50, %v102_v24  ;;  %v130_v35 = vmul.u32 %v126_v59, %v103_v21  ;;  %v413_v41 = vsel %vm401_vm6, %v1774_v48, %v412_v42 }
  0xcb   :  { %v778_v45 = vsel %vm776_vm8, %v777_v47, %v773_v22  ;;  %v106_v51 = vmul.u32 %v104_v36, %v102_v24  ;;  %v110_v55 = vshll.u32 %v107_v43, 16  ;;  %v109_v13 = vmul.u32 %v105_v10, %v103_v21 }
  0xcc   :  { %v779_v57 = vadd.s32 %v778_v45, %v774_v49  ;;  %v128_v4 = vmul.u32 %v126_v59, %v102_v24  ;;  %v132_v15 = vshll.u32 %v129_v38, 16  ;;  %v112_v26 = vshll.u32 %v108_v30, 16 }
  0xcd   :  { %vm114_vm9 = vc.u32 %v106_v51, %v110_v55  ;;  %v116_v63 = vadd.s32 %v110_v55, %v106_v51  ;;  %v131_v16 = vmul.u32 %v127_v50, %v103_v21  ;;  %v134_v40 = vshll.u32 %v130_v35, 16 }
  0xce   :  { %v780_v20 = vadd.s32 536870912, %v779_v57  ;;  %v115_v29 = vsel %vm114_vm9, 1, %v1504_v1  ;;  %vm136_vm10 = vc.u32 %v128_v4, %v132_v15  ;;  %v138_v22 = vadd.s32 %v132_v15, %v128_v4 }
  0xcf   :  { %v117_v23 = vadd.s32 %v115_v29, %v109_v13  ;;  %vm118_vm11 = vc.u32 %v116_v63, %v112_v26  ;;  %v137_v48 = vsel %vm136_vm10, 1, %v1504_v1  ;;  %v69_v10 = vshrl.u32 %v1512_v53, %v1601_v58 }
  0xd0   :  { %v1864_v36 = vshrl.u32 %v780_v20, 30  ;;  %v119_v59 = vsel %vm118_vm11, 1, %v1504_v1  ;;  %v139_v24 = vadd.s32 %v137_v48, %v131_v16  ;;  %v90_v50 = vsel %vm88_vm7, %v1801_v61, 2102212464 }
  0xd1   :  { %v111_v21 = vshrl.u32 %v107_v43, 16  ;;  %v121_v42 = vadd.s32 %v119_v59, %v117_v23  ;;  %vm140_vm12 = vc.u32 %v138_v22, %v134_v40  ;;  %v113_v49 = vshrl.u32 %v108_v30, 16 }
  0xd2   :  { %v782_v47 = vshll.u32 %v1864_v36, 30  ;;  %v141_v45 = vsel %vm140_vm12, 1, %v1504_v1  ;;  %vm400_vm13 = vcmp.lt.s32.totalorder %v1744_v12, 2  ;;  %v133_v55 = vshrl.u32 %v129_v38, 16 }
  0xd3   :  { %v122_v51 = vadd.s32 %v121_v42, %v111_v21  ;;  %v143_v58 = vadd.s32 %v141_v45, %v139_v24  ;;  %v414_v13 = vsel %vm400_vm13, %v411_v31, %v413_v41  ;;  %v89_v23 = vsel %vm85_vm3, %v69_v10, %v1791_v0 }
  0xd4   :  { %v1877_v4 = vsub.s32 %v779_v57, %v782_v47  ;;  %v91_v61 = vsel %vm87_vm4, %v1798_v46, %v90_v50  ;;  %v419_v43 = vshrl.u32 %v414_v13, 16  ;;  %v135_v15 = vshrl.u32 %v130_v35, 16 }
  0xd5   :  { %v1885_v30 = vadd.s32 %v122_v51, %v113_v49  ;;  %v144_v26 = vadd.s32 %v143_v58, %v133_v55  ;;  %v418_v38 = vand.u32 65535, %v414_v13  ;;  %v1889_v41 = vadd.s32 %v138_v22, %v134_v40 }
  0xd6   :  { %vm784_vm7 = vcmp.lt.s32.totalorder %v1877_v4, 0  ;;  %v785_v31 = vsub.s32 0, %v1877_v4  ;;  %v410_v57 = vsel %vm400_vm13, %v407_v28, %v409_v2  ;;  %v1068_v0 = vand.u32 65535, %v1751_v17 }
  0xd7   :  { %v92_v46 = vsel %vm86_vm5, %v89_v23, %v91_v61  ;;  %v145_v63 = vadd.s32 %v144_v26, %v135_v15  ;;  %v1897_v16 = vmul.u32 %v419_v43, %v1719_v52  ;;  %v1902_v35 = vmul.u32 %v1046_v3, %v1704_v39 }
  0xd8   :  { %v1069_v20 = vshrl.u32 %v1751_v17, 16  ;;  %v786_v29 = vsel %vm784_vm7, %v785_v31, %v1877_v4  ;;  %vm148_vm14 = vc.u32 %v1885_v30, %v1889_v41  ;;  %v1909_v62 = vmul.u32 %v418_v38, %v1733_v60 }
  0xd9   :  { %v787_v28 = vclz %v786_v29  ;;  %v149_v2 = vadd.s32 1, %v145_v63  ;;  %v440_v40 = vand.u32 65535, %v410_v57  ;;  %v146_v48 = vmul.u32 %v1834_v34, %v92_v46 }
  0xda   :  { %v420_v22 = vmul.u32 %v418_v38, %v1719_v52  ;;  %v424_v10 = vshll.u32 %v1897_v16, 16  ;;  %v441_v59 = vshrl.u32 %v410_v57, 16  ;;  %v423_v21 = vmul.u32 %v419_v43, %v1733_v60 }
  0xdb   :  { %v1385_v24 = vadd.s32 4294967294, %v787_v28  ;;  %v150_v50 = vsel %vm148_vm14, %v149_v2, %v145_v63  ;;  %v426_v42 = vshll.u32 %v1909_v62, 16  ;;  %vm683_vm2 = vcmp.lt.s32.totalorder %v1551_v8, 0 }
  0xdc   :  { %v151_v47 = vadd.s32 %v150_v50, %v146_v48  ;;  %vm428_vm1 = vc.u32 %v420_v22, %v424_v10  ;;  %v430_v49 = vadd.s32 %v424_v10, %v420_v22  ;;  %v1917_v45 = vmul.u32 %v441_v59, %v1719_v52 }
  0xdd   :  { %v1923_v34 = vmul.u32 %v1047_v19, %v1704_v39  ;;  %vm1386_vm3 = vcmp.lt.s32.totalorder %v1385_v24, 0  ;;  %v429_v51 = vsel %vm428_vm1, 1, %v1504_v1  ;;  %v1927_v55 = vmul.u32 %v440_v40, %v1733_v60 }
  0xde   :  { %v790_v58 = vsel %vm1386_vm3, 0, %v1385_v24  ;;  %v152_v13 = vadd.s32 536870912, %v151_v47  ;;  %v431_v23 = vadd.s32 %v429_v51, %v423_v21  ;;  %vm432_vm4 = vc.u32 %v430_v49, %v426_v42 }
  0xdf   :  { %v775_v61 = vadd.s32 %v1828_v54, %v1816_v11  ;;  %v791_v43 = vsub.s32 32, %v790_v58  ;;  %v795_v15 = vsub.s32 4294967266, %v790_v58  ;;  %v433_v26 = vsel %vm432_vm4, 1, %v1504_v1 }
  0xe0   :  { %v805_v38 = vsub.s32 4, %v1864_v36  ;;  %v1933_v31 = vshrl.u32 %v152_v13, 30  ;;  %v442_v57 = vmul.u32 %v440_v40, %v1719_v52  ;;  %v446_v46 = vshll.u32 %v1917_v45, 16 }
  0xe1   :  { %vm1939_vm5 = vcmp.le.f32.partialorder %v681_v14, 0.7853982  ;;  %v792_v11 = vshll.u32 %v1877_v4, %v790_v58  ;;  %v793_v54 = vshrl.u32 %v775_v61, %v791_v43  ;;  %v796_v29 = vadd.s32 127, %v795_v15 }
  0xe2   :  { %v445_v28 = vmul.u32 %v441_v59, %v1733_v60  ;;  %v154_v2 = vshll.u32 %v1933_v31, 30  ;;  %v435_v48 = vadd.s32 %v433_v26, %v431_v23  ;;  %v448_v22 = vshll.u32 %v1927_v55, 16 }
  0xe3   :  { %vm450_vm8 = vc.u32 %v442_v57, %v446_v46  ;;  %v794_v52 = vor.u32 %v793_v54, %v792_v11  ;;  %v797_v40 = vshll.u32 %v796_v29, 23  ;;  %v452_v14 = vadd.s32 %v446_v46, %v442_v57 }
  0xe4   :  { %v451_v10 = vsel %vm450_vm8, 1, %v1504_v1  ;;  %v1951_v24 = vmul.u32 %v1047_v19, %v1707_v44  ;;  %v1052_v4 = vshll.u32 %v1923_v34, 16  ;;  %v155_v50 = vsub.s32 %v151_v47, %v154_v2 }
  0xe5   :  { %v404_v60 = vsel %vm402_vm15, %v1769_v33, 2102212464  ;;  %v798_v59 = vor.u32 4788187, %v797_v40  ;;  %v425_v21 = vshrl.u32 %v1897_v16, 16  ;;  %v453_v42 = vadd.s32 %v451_v10, %v445_v28 }
  0xe6   :  { %vm454_vm9 = vc.u32 %v452_v14, %v448_v22  ;;  %v806_v49 = vsel %vm683_vm2, %v805_v38, %v1864_v36  ;;  %vm156_vm10 = vcmp.lt.s32.totalorder %v155_v50, 0  ;;  %v157_v51 = vsub.s32 0, %v155_v50 }
  0xe7   :  { %v383_v19 = vshrl.u32 %v1512_v53, %v1694_v27  ;;  %v799_v58 = vand.u32 2147483647, %v798_v59  ;;  %v801_v47 = vcvt.s32.f32 %v794_v52  ;;  %v436_v13 = vadd.s32 %v435_v48, %v425_v21 }
  0xe8   :  { %v455_v23 = vsel %vm454_vm9, 1, %v1504_v1  ;;  %v158_v33 = vsel %vm156_vm10, %v157_v51, %v155_v50  ;;  %v405_v61 = vsel %vm401_vm6, %v1765_v37, %v404_v60  ;;  %v427_v36 = vshrl.u32 %v1909_v62, 16 }
  0xe9   :  { %v403_v16 = vsel %vm399_vm0, %v383_v19, %v1757_v6  ;;  %v802_v43 = vmul.f32 %v801_v47, %v799_v58  ;;  %v159_v15 = vclz %v158_v33  ;;  %v447_v53 = vshrl.u32 %v1917_v45, 16 }
  0xea   :  { %v457_v27 = vadd.s32 %v455_v23, %v453_v42  ;;  %v1975_v26 = vmul.u32 %v1069_v20, %v1704_v39  ;;  %v1980_v6 = vmul.u32 %v1069_v20, %v1707_v44  ;;  %v1984_v37 = vsel %vm1939_vm5, 0, %v806_v49 }
  0xeb   :  { %v449_v62 = vshrl.u32 %v1927_v55, 16  ;;  %v803_v38 = vxor.u32 2147483648, %v802_v43  ;;  %v1373_v57 = vadd.s32 4294967294, %v159_v15  ;;  %v1987_v45 = vadd.s32 %v436_v13, %v427_v36 }
  0xec   :  { %v458_v46 = vadd.s32 %v457_v27, %v447_v53  ;;  %vm1990_vm15 = vc.u32 %v1902_v35, %v1052_v4  ;;  %v1058_v54 = vadd.s32 %v1052_v4, %v1902_v35  ;;  %v406_v20 = vsel %vm400_vm13, %v403_v16, %v405_v61 }
  0xed   :  { %v2000_v29 = vmul.u32 %v1046_v3, %v1707_v44  ;;  %v804_v55 = vsel %vm683_vm2, %v803_v38, %v802_v43  ;;  %vm1374_vm0 = vcmp.lt.s32.totalorder %v1373_v57, 0  ;;  %v2004_v28 = vadd.s32 %v452_v14, %v448_v22 }
  0xee   :  { %v459_v2 = vadd.s32 %v458_v46, %v449_v62  ;;  %v2009_v48 = vsel %vm1939_vm5, %v1551_v8, %v804_v55  ;;  %v2012_v12 = vand.u32 3, %v1984_v37  ;;  %v147_v56 = vadd.s32 %v1889_v41, %v1885_v30 }
  0xef   :  { %v162_v3 = vsel %vm1374_vm0, 0, %v1373_v57  ;;  %v809_v35 = vmul.f32 %v2009_v48, %v2009_v48  ;;  %vm462_vm6 = vc.u32 %v1987_v45, %v2004_v28  ;;  %v1054_v63 = vshll.u32 %v2000_v29, 16 }
  0xf0   :  { %v163_v52 = vsub.s32 32, %v162_v3  ;;  %v167_v40 = vsub.s32 4294967266, %v162_v3  ;;  %v164_v22 = vshll.u32 %v155_v50, %v162_v3  ;;  %v463_v10 = vadd.s32 1, %v459_v2 }
  0xf1   :  { %v1057_v14 = vsel %vm1990_vm15, 1, %v1504_v1  ;;  %v810_v4 = vmul.f32 -0.001358992, %v809_v35  ;;  %v817_v60 = vmul.f32 -0.00019511016, %v809_v35  ;;  %v460_v59 = vmul.u32 %v1679_v18, %v406_v20 }
  0xf2   :  { %v165_v30 = vshrl.u32 %v147_v56, %v163_v52  ;;  %v168_v41 = vadd.s32 127, %v167_v40  ;;  %v464_v21 = vsel %vm462_vm6, %v463_v10, %v459_v2  ;;  %vm1060_vm11 = vc.u32 %v1058_v54, %v1054_v63 }
  0xf3   :  { %v1074_v42 = vshll.u32 %v1975_v26, 16  ;;  %v811_v49 = vadd.f32 0.041655596, %v810_v4  ;;  %v818_v51 = vadd.f32 0.008332121, %v817_v60  ;;  %vm55_vm12 = vcmp.lt.s32.totalorder %v1553_v9, 0 }
  0xf4   :  { %v166_v50 = vor.u32 %v165_v30, %v164_v22  ;;  %v169_v19 = vshll.u32 %v168_v41, 23  ;;  %v465_v58 = vadd.s32 %v464_v21, %v460_v59  ;;  %v1059_v47 = vadd.s32 %v1057_v14, %v1951_v24 }
  0xf5   :  { %v1070_v13 = vmul.u32 %v1068_v0, %v1704_v39  ;;  %v2034_v18 = vmul.u32 %v1068_v0, %v1707_v44  ;;  %v812_v23 = vmul.f32 %v811_v49, %v809_v35  ;;  %v819_v33 = vmul.f32 %v818_v51, %v809_v35 }
  0xf6   :  { %v2173_v16 = vand.u32 2147483647, %v1553_v9  ;;  %v170_v36 = vor.u32 4788187, %v169_v19  ;;  %v1061_v24 = vsel %vm1060_vm11, 1, %v1504_v1  ;;  %v173_v43 = vcvt.s32.f32 %v166_v50 }
  0xf7   :  { %v177_v15 = vsub.s32 4, %v1933_v31  ;;  %v466_v39 = vadd.s32 536870912, %v465_v58  ;;  %vm1078_vm7 = vc.u32 %v1070_v13, %v1074_v42  ;;  %v813_v53 = vadd.f32 -0.4999988, %v812_v23 }
  0xf8   :  { %vm2038_vm13 = vcmp.le.f32.partialorder %v2173_v16, 0.7853982  ;;  %v820_v17 = vadd.f32 -0.16666654, %v819_v33  ;;  %v171_v44 = vand.u32 2147483647, %v170_v36  ;;  %v1080_v0 = vadd.s32 %v1074_v42, %v1070_v13 }
  0xf9   :  { %v2044_v27 = vshrl.u32 %v466_v39, 30  ;;  %v1063_v62 = vadd.s32 %v1061_v24, %v1059_v47  ;;  %v1076_v38 = vshll.u32 %v2034_v18, 16  ;;  %v1079_v57 = vsel %vm1078_vm7, 1, %v1504_v1 }
  0xfa   :  { %v814_v46 = vmul.f32 %v813_v53, %v809_v35  ;;  %v821_v11 = vmul.f32 %v820_v17, %v809_v35  ;;  %vm981_vm14 = vcmp.lt.s32.totalorder %v2012_v12, 2  ;;  %v174_v54 = vmul.f32 %v173_v43, %v171_v44 }
  0xfb   :  { %vm824_vm1 = vweird.f32 %v1551_v8  ;;  %v468_v20 = vshll.u32 %v2044_v27, 30  ;;  %v1053_v55 = vshrl.u32 %v1923_v34, 16  ;;  %v1081_v2 = vadd.s32 %v1079_v57, %v1980_v6 }
  0xfc   :  { %vm1082_vm2 = vc.u32 %v1080_v0, %v1076_v38  ;;  %v2053_v56 = vadd.f32 1.0, %v814_v46  ;;  %v822_v3 = vadd.f32 1.0, %v821_v11  ;;  %v175_v52 = vxor.u32 2147483648, %v174_v54 }
  0xfd   :  { %v1083_v40 = vsel %vm1082_vm2, 1, %v1504_v1  ;;  %vm982_vm3 = vcmp.eq.s32.totalorder %v2012_v12, 0  ;;  %v178_v35 = vsel %vm55_vm12, %v177_v15, %v1933_v31  ;;  %v469_v22 = vsub.s32 %v465_v58, %v468_v20 }
  0xfe   :  { %v1064_v10 = vadd.s32 %v1063_v62, %v1053_v55  ;;  %v2061_v63 = vmul.f32 %v822_v3, %v2009_v48  ;;  %v832_v34 = vxor.u32 2147483648, %v2053_v56  ;;  %v176_v6 = vsel %vm55_vm12, %v175_v52, %v174_v54 }
  0xff   :  { %v1055_v14 = vshrl.u32 %v2000_v29, 16  ;;  %v179_v1 = vsel %vm2038_vm13, %v1553_v9, %v176_v6  ;;  %vm470_vm4 = vcmp.lt.s32.totalorder %v469_v22, 0  ;;  %v471_v4 = vsub.s32 0, %v469_v22 }
 0x100   :  { %v1085_v60 = vadd.s32 %v1083_v40, %v1081_v2  ;;  %v829_v31 = vxor.u32 2147483648, %v2061_v63  ;;  %vm985_vm5 = vcmp.eq.s32.totalorder %v2012_v12, 2  ;;  %v180_v48 = vsel %vm2038_vm13, 0, %v178_v35 }
 0x101   :  { %v181_v30 = vmul.f32 %v179_v1, %v179_v1  ;;  %v987_v41 = vsel %vm985_vm5, %v832_v34, %v2061_v63  ;;  %v472_v29 = vsel %vm470_vm4, %v471_v4, %v469_v22  ;;  %v2077_v59 = vadd.s32 %v1064_v10, %v1055_v14 }
 0x102   :  { %v1075_v21 = vshrl.u32 %v1975_v26, 16  ;;  %v984_v42 = vsel %vm982_vm3, %v2053_v56, %v829_v31  ;;  %v473_v50 = vclz %v472_v29  ;;  %v1077_v58 = vshrl.u32 %v2034_v18, 16 }
 0x103   :  { %v182_v49 = vmul.f32 -0.001358992, %v181_v30  ;;  %v189_v51 = vmul.f32 -0.00019511016, %v181_v30  ;;  %v988_v19 = vsel %vm981_vm14, %v984_v42, %v987_v41  ;;  %v2088_v47 = vadd.s32 %v1080_v0, %v1076_v38 }
 0x104   :  { %v1086_v13 = vadd.s32 %v1085_v60, %v1075_v21  ;;  %v989_v26 = vsel %vm824_vm1, nan, %v988_v19  ;;  %v1379_v16 = vadd.s32 4294967294, %v473_v50  ;;  %v1088_v12 = vmul.u32 %v1665_v7, %v1742_v5 }
 0x105   :  { %v183_v23 = vadd.f32 0.041655596, %v182_v49  ;;  %v190_v33 = vadd.f32 0.008332121, %v189_v51  ;;  %1321 = vrot.lane.b32.xlu0 %v989_v26, %s1513_s0  ;;  %vm1090_vm9 = vc.u32 %v2077_v59, %v2088_v47  ;;  %v197_v18 = vadd.s32 3, %v180_v48 }
 0x106   :  { %v1087_v61 = vadd.s32 %v1086_v13, %v1077_v58  ;;  %vm1380_vm8 = vcmp.lt.s32.totalorder %v1379_v16, 0  ;;  %v461_v17 = vadd.s32 %v2004_v28, %v1987_v45  ;;  %v352_v20 = vand.u32 3, %v180_v48 }
 0x107   :  { %v184_v36 = vmul.f32 %v183_v23, %v181_v30  ;;  %v191_v24 = vmul.f32 %v190_v33, %v181_v30  ;;  %v476_v43 = vsel %vm1380_vm8, 0, %v1379_v16  ;;  %v198_v54 = vand.u32 3, %v197_v18 }
 0x108   :  { %v1091_v15 = vadd.s32 1, %v1087_v61  ;;  %v477_v44 = vsub.s32 32, %v476_v43  ;;  %v481_v0 = vsub.s32 4294967266, %v476_v43  ;;  %v478_v55 = vshll.u32 %v469_v22, %v476_v43 }
 0x109   :  { %v185_v39 = vadd.f32 -0.4999988, %v184_v36  ;;  %v192_v53 = vadd.f32 -0.16666654, %v191_v24  ;;  %vm203_vm10 = vcmp.eq.s32.totalorder %v198_v54, 2  ;;  %vm353_vm15 = vcmp.lt.s32.totalorder %v352_v20, 2 }
 0x10a   :  { %v1092_v62 = vsel %vm1090_vm9, %v1091_v15, %v1087_v61  ;;  %v479_v46 = vshrl.u32 %v461_v17, %v477_v44  ;;  %v482_v2 = vadd.s32 127, %v481_v0  ;;  %vm354_vm0 = vcmp.eq.s32.totalorder %v352_v20, 0 }
 0x10b   :  { %v186_v38 = vmul.f32 %v185_v39, %v181_v30  ;;  %v193_v57 = vmul.f32 %v192_v53, %v181_v30  ;;  %v1093_v11 = vadd.s32 %v1092_v62, %v1088_v12  ;;  %vm357_vm6 = vcmp.eq.s32.totalorder %v352_v20, 2 }
 0x10c   :  { %v480_v52 = vor.u32 %v479_v46, %v478_v55  ;;  %v483_v40 = vshll.u32 %v482_v2, 23  ;;  %vm199_vm11 = vcmp.lt.s32.totalorder %v198_v54, 2  ;;  %vm200_vm12 = vcmp.eq.s32.totalorder %v198_v54, 0 }
 0x10d   :  { %v187_v7 = vadd.f32 1.0, %v186_v38  ;;  %v194_v5 = vadd.f32 1.0, %v193_v57  ;;  %v1094_v3 = vadd.s32 536870912, %v1093_v11  ;;  %vm196_vm13 = vweird.f32 %v1553_v9 }
 0x10e   :  { %v484_v45 = vor.u32 4788187, %v483_v40  ;;  %v487_v60 = vcvt.s32.f32 %v480_v52  ;;  %vm369_vm14 = vcmp.lt.s32.totalorder %v1572_v32, 0  ;;  %v2176_v13 = vand.u32 2147483647, %v1572_v32 }
 0x10f   :  { %v195_v35 = vmul.f32 %v194_v5, %v179_v1  ;;  %v204_v10 = vxor.u32 2147483648, %v187_v7  ;;  %v2098_v6 = vshrl.u32 %v1094_v3, 30  ;;  %v491_v23 = vsub.s32 4, %v2044_v27 }
 0x110   :  { %v485_v22 = vand.u32 2147483647, %v484_v45  ;;  %vm2108_vm2 = vcmp.le.f32.partialorder %v2176_v13, 0.7853982  ;;  %v1089_v53 = vadd.s32 %v2088_v47, %v2077_v59  ;;  %v825_v45 = vadd.s32 3, %v1984_v37 }
 0x111   :  { %v201_v28 = vxor.u32 2147483648, %v195_v35  ;;  %v205_v14 = vsel %vm203_vm10, %v204_v10, %v195_v35  ;;  %v1096_v4 = vshll.u32 %v2098_v6, 30  ;;  %v359_v30 = vsel %vm357_vm6, %v204_v10, %v195_v35 }
 0x112   :  { %v488_v42 = vmul.f32 %v487_v60, %v485_v22  ;;  %v492_v24 = vsel %vm369_vm14, %v491_v23, %v2044_v27  ;;  %vm997_vm4 = vcmp.lt.s32.totalorder %v1561_v25, 0  ;;  %vm510_vm5 = vweird.f32 %v1572_v32 }
 0x113   :  { %v356_v48 = vsel %vm354_vm0, %v187_v7, %v201_v28  ;;  %v202_v41 = vsel %vm200_vm12, %v187_v7, %v201_v28  ;;  %v1097_v1 = vsub.s32 %v1093_v11, %v1096_v4  ;;  %v494_v44 = vsel %vm2108_vm2, 0, %v492_v24 }
 0x114   :  { %v360_v29 = vsel %vm353_vm15, %v356_v48, %v359_v30  ;;  %v206_v21 = vsel %vm199_vm11, %v202_v41, %v205_v14  ;;  %v489_v19 = vxor.u32 2147483648, %v488_v42  ;;  %v511_v20 = vadd.s32 3, %v494_v44 }
 0x115   :  { %v361_v49 = vsel %vm196_vm13, nan, %v360_v29  ;;  %v2103_v51 = vsel %vm196_vm13, nan, %v206_v21  ;;  %vm1098_vm7 = vcmp.lt.s32.totalorder %v1097_v1, 0  ;;  %v1099_v50 = vsub.s32 0, %v1097_v1 }
 0x116   :  { %1305 = vrot.lane.b32.xlu2 %v361_v49, %s1514_s1  ;;  %v490_v9 = vsel %vm369_vm14, %v489_v19, %v488_v42  ;;  %v666_v3 = vand.u32 3, %v494_v44  ;;  %v512_v40 = vand.u32 3, %v511_v20  ;;  %v826_v48 = vand.u32 3, %v825_v45 }
 0x117   :  { %v1100_v58 = vsel %vm1098_vm7, %v1099_v50, %v1097_v1  ;;  %v493_v16 = vsel %vm2108_vm2, %v1572_v32, %v490_v9  ;;  %v2179_v42 = vand.u32 2147483647, %v1561_v25  ;;  %v1119_v13 = vsub.s32 4, %v2098_v6 }
 0x118   :  { %v1101_v33 = vclz %v1100_v58  ;;  %v495_v61 = vmul.f32 %v493_v16, %v493_v16  ;;  %vm667_vm8 = vcmp.lt.s32.totalorder %v666_v3, 2  ;;  %vm668_vm9 = vcmp.eq.s32.totalorder %v666_v3, 0 }
 0x119   :  { %vm671_vm10 = vcmp.eq.s32.totalorder %v666_v3, 2  ;;  %vm513_vm15 = vcmp.lt.s32.totalorder %v512_v40, 2  ;;  %vm514_vm0 = vcmp.eq.s32.totalorder %v512_v40, 0  ;;  %vm517_vm6 = vcmp.eq.s32.totalorder %v512_v40, 2 }
 0x11a   :  { %v1391_v36 = vadd.s32 4294967294, %v1101_v33  ;;  %v496_v12 = vmul.f32 -0.001358992, %v495_v61  ;;  %v503_v18 = vmul.f32 -0.00019511016, %v495_v61  ;;  %vm828_vm12 = vcmp.eq.s32.totalorder %v826_v48, 0 }
 0x11b   :  { %vm2126_vm11 = vcmp.le.f32.partialorder %v2179_v42, 0.7853982  ;;  %v830_v23 = vsel %vm828_vm12, %v2053_v56, %v829_v31  ;;  %vm831_vm13 = vcmp.eq.s32.totalorder %v826_v48, 2  ;;  %v1120_v32 = vsel %vm997_vm4, %v1119_v13, %v2098_v6 }
 0x11c   :  { %vm1392_vm3 = vcmp.lt.s32.totalorder %v1391_v36, 0  ;;  %v497_v15 = vadd.f32 0.041655596, %v496_v12  ;;  %v504_v39 = vadd.f32 0.008332121, %v503_v18  ;;  %vm827_vm7 = vcmp.lt.s32.totalorder %v826_v48, 2 }
 0x11d   :  { %v1104_v43 = vsel %vm1392_vm3, 0, %v1391_v36  ;;  %v1122_v18 = vsel %vm2126_vm11, 0, %v1120_v32  ;;  %vm1344_vm12 = vcmask 916480  }
 0x11e   :  { %v1105_v17 = vsub.s32 32, %v1104_v43  ;;  %v1109_v0 = vsub.s32 4294967266, %v1104_v43  ;;  %v498_v62 = vmul.f32 %v497_v15, %v495_v61  ;;  %v505_v38 = vmul.f32 %v504_v39, %v495_v61 }
 0x11f   :  { %v1106_v46 = vshll.u32 %v1097_v1, %v1104_v43  ;;  %v1139_v6 = vadd.s32 3, %v1122_v18 }
 0x120   :  { %v1107_v57 = vshrl.u32 %v1089_v53, %v1105_v17  ;;  %v1110_v11 = vadd.s32 127, %v1109_v0  ;;  %v499_v27 = vadd.f32 -0.4999988, %v498_v62  ;;  %v506_v54 = vadd.f32 -0.16666654, %v505_v38 }
 0x121   :  { %v1140_v0 = vand.u32 3, %v1139_v6 }
 0x122   :  { %v1108_v55 = vor.u32 %v1107_v57, %v1106_v46  ;;  %v1111_v2 = vshll.u32 %v1110_v11, 23  ;;  %v500_v7 = vmul.f32 %v499_v27, %v495_v61  ;;  %v507_v5 = vmul.f32 %v506_v54, %v495_v61 }
 0x123   :  { %v833_v61 = vsel %vm831_vm13, %v832_v34, %v2061_v63  ;;  %v1294_v34 = vand.u32 3, %v1122_v18  ;;  %vm1141_vm3 = vcmp.lt.s32.totalorder %v1140_v0, 2 }
 0x124   :  { %v1112_v52 = vor.u32 4788187, %v1111_v2  ;;  %v501_v59 = vadd.f32 1.0, %v500_v7  ;;  %v508_v47 = vadd.f32 1.0, %v507_v5  ;;  %v1115_v10 = vcvt.s32.f32 %v1108_v55 }
 0x125   :  { %v834_v12 = vsel %vm827_vm7, %v830_v23, %v833_v61  ;;  %vm1295_vm14 = vcmp.lt.s32.totalorder %v1294_v34, 2  ;;  %vm1296_vm2 = vcmp.eq.s32.totalorder %v1294_v34, 0 }
 0x126   :  { %v1113_v35 = vand.u32 2147483647, %v1112_v52  ;;  %v509_v28 = vmul.f32 %v508_v47, %v493_v16  ;;  %v518_v14 = vxor.u32 2147483648, %v501_v59  ;;  %v835_v15 = vsel %vm824_vm1, nan, %v834_v12 }
 0x127   :  { %vm1299_vm1 = vcmp.eq.s32.totalorder %v1294_v34, 2 }
 0x128   :  { %v1116_v4 = vmul.f32 %v1115_v10, %v1113_v35  ;;  %v515_v22 = vxor.u32 2147483648, %v509_v28  ;;  %v673_v41 = vsel %vm671_vm10, %v518_v14, %v509_v28  ;;  %v519_v37 = vsel %vm517_vm6, %v518_v14, %v509_v28 }
 0x129   :  { %vm1334_vm10 = vcmask 261120   ;;  %vm1340_vm6 = vcmask 654336  }
 0x12a   :  { %v1117_v60 = vxor.u32 2147483648, %v1116_v4  ;;  %v670_v30 = vsel %vm668_vm9, %v501_v59, %v515_v22  ;;  %v516_v1 = vsel %vm514_vm0, %v501_v59, %v515_v22  ;;  %vm1332_vm9 = vcmask 130048  }
 0x12b   :  { %v674_v29 = vsel %vm667_vm8, %v670_v30, %v673_v41  ;;  %v520_v21 = vsel %vm513_vm15, %v516_v1, %v519_v37  ;;  %vm1138_vm8 = vweird.f32 %v1561_v25  ;;  %vm1336_vm15 = vcmask 392192  }
 0x12c   :  { %v1118_v50 = vsel %vm997_vm4, %v1117_v60, %v1116_v4  ;;  %v675_v19 = vsel %vm510_vm5, nan, %v674_v29  ;;  %v521_v58 = vsel %vm510_vm5, nan, %v520_v21  ;;  %vm1142_vm4 = vcmp.eq.s32.totalorder %v1140_v0, 0 }
 0x12d   :  { %v1121_v26 = vsel %vm2126_vm11, %v1561_v25, %v1118_v50  ;;  %1313 = vrot.lane.b32.xlu1 %v675_v19, %s1515_s27  ;;  %1309 = vrot.lane.b32.xlu2 %v521_v58, %s1516_s28  ;;  %vm1145_vm5 = vcmp.eq.s32.totalorder %v1140_v0, 2  ;;  %vm1338_vm0 = vcmask 523264   ;;  %vm1342_vm11 = vcmask 785408  }
 0x12e   :  { %v1123_v9 = vmul.f32 %v1121_v26, %v1121_v26 }
 0x130   :  { %v1124_v33 = vmul.f32 -0.001358992, %v1123_v9  ;;  %v1131_v16 = vmul.f32 -0.00019511016, %v1123_v9 }
 0x132   :  { %v1125_v36 = vadd.f32 0.041655596, %v1124_v33  ;;  %v1132_v24 = vadd.f32 0.008332121, %v1131_v16 }
 0x134   :  { %v1126_v43 = vmul.f32 %v1125_v36, %v1123_v9  ;;  %v1133_v31 = vmul.f32 %v1132_v24, %v1123_v9 }
 0x135   :  { %1317 = vrot.lane.b32.xlu2 %v835_v15, %s1517_s29 }
 0x136   :  { %v1127_v39 = vadd.f32 -0.4999988, %v1126_v43  ;;  %v1134_v53 = vadd.f32 -0.16666654, %v1133_v31 }
 0x138   :  { %v1128_v17 = vmul.f32 %v1127_v39, %v1123_v9  ;;  %v1135_v44 = vmul.f32 %v1134_v53, %v1123_v9 }
 0x13a   :  { %v1129_v56 = vadd.f32 1.0, %v1128_v17  ;;  %v1136_v63 = vadd.f32 1.0, %v1135_v44 }
 0x13c   :  { %v1137_v62 = vmul.f32 %v1136_v63, %v1121_v26  ;;  %v1146_v38 = vxor.u32 2147483648, %v1129_v56 }
 0x13e   :  { %v1143_v57 = vxor.u32 2147483648, %v1137_v62  ;;  %v1147_v46 = vsel %vm1145_vm5, %v1146_v38, %v1137_v62  ;;  %v1301_v27 = vsel %vm1299_vm1, %v1146_v38, %v1137_v62 }
 0x140   :  { %v1144_v8 = vsel %vm1142_vm4, %v1129_v56, %v1143_v57  ;;  %v1298_v11 = vsel %vm1296_vm2, %v1129_v56, %v1143_v57 }
 0x141   :  { %v1148_v54 = vsel %vm1141_vm3, %v1144_v8, %v1147_v46  ;;  %v1302_v20 = vsel %vm1295_vm14, %v1298_v11, %v1301_v27 }
 0x142   :  { %v1149_v55 = vsel %vm1138_vm8, nan, %v1148_v54  ;;  %v1303_v2 = vsel %vm1138_vm8, nan, %v1302_v20 }
 0x143   :  { %1325 = vrot.lane.b32.xlu1 %v1149_v55, %s1518_s30  ;;  %1329 = vrot.lane.b32.xlu2 %v1303_v2, %s1519_s3 }
 0x170   :  { %v1306_v7 = vpop.permute.xlu2 %1305 }
 0x171   :  { %v1333_v59 = vsel %vm1332_vm9, %v2103_v51, %v1306_v7 }
 0x177   :  { %v1322_v35 = vpop.permute.xlu0 %1321 }
 0x187   :  { %v1310_v5 = vpop.permute.xlu2 %1309 }
 0x188   :  { %v1335_v47 = vsel %vm1334_vm10, %v1333_v59, %v1310_v5 }
 0x18f   :  { %v1318_v52 = vpop.permute.xlu2 %1317 }
 0x19d   :  { %v1330_v28 = vpop.permute.xlu2 %1329 }
 0x19f   :  { %v1314_v3 = vpop.permute.xlu1 %1313 }
 0x1a0   :  { %v1337_v25 = vsel %vm1336_vm15, %v1335_v47, %v1314_v3 }
 0x1a1   :  { %v1339_v40 = vsel %vm1338_vm0, %v1337_v25, %v1318_v52 }
 0x1a2   :  { %v1341_v45 = vsel %vm1340_vm6, %v1339_v40, %v1322_v35 }
 0x1b5   :  { %v1326_v10 = vpop.permute.xlu1 %1325 }
 0x1b6   :  { %v1343_v51 = vsel %vm1342_vm11, %v1341_v45, %v1326_v10 }
 0x1b7   :  { %v1345_v14 = vsel %vm1344_vm12, %v1343_v51, %v1330_v28 }
 0x1b8   :  { %1346 = vst [vmem:[#allocation7] sm:$0x3] %v1345_v14 }
 0x1b9   :  { %1494 = shalt.err (!%p1491_p5)
}
 0x1ba   :  { %1359 = dma.vmem_to_hbm [thread:$0]  %s1355_s8, 32, %s1357_s11, [#allocation4]  }
 0x1bb   :  { %1499 = dma.done.wait [#allocation4], 32  }
 0x1bc   :  { %1500 = vsyncadd [#allocation4], 4294967264 }
 0x1bd   :  { %1364 = vsyncpa [#allocation3], 1 }
 0x1be   :  { %1365 = vsyncpa [#allocation6], 1 }
 0x1bf   :  { %1366 = vsyncpa [#allocation4], 1 }

// kernel: tpu_custom_call.1
= control target key start
LH: loop header
LB: loop body
LE: loop exit
PB: predicated region body
PF: predicated region fallthrough
CT: control target
= control target key end

     0   :  { %7 = vsyncpa [#allocation3], 0  ;;  %s2140_s0 = inlined_call_operand.hbm [shape: f32[2,4], index: 0, kind: input, shape index: {}]   ;;  %s2141_s1 = inlined_call_operand.hbm [shape: f32[1,16], index: 1, kind: input, shape index: {}]   ;;  %s2142_s2 = inlined_call_operand.hbm [shape: f32[2,128], index: 2, kind: output, shape index: {}]  }
   0x1   :  { %8 = vsyncpa [#allocation6], 0 }
   0x2   :  { %9 = vsyncpa [#allocation4], 0  ;;  %s15_s11 = sshll.u32 %s2140_s0, 4  ;;  %s1491_s12 = smov [#allocation2]   ;;  %s16_s11 = int_to_ptr.hbm [resolvable:$true] %s15_s11 }
   0x3   :  { %s17_s13 = sshll.u32 %s1491_s12, 4  ;;  %s26_s16 = sshll.u32 %s2141_s1, 4  ;;  %s18_s13 = int_to_ptr.vmem [resolvable:$true] %s17_s13  ;;  %s27_s16 = int_to_ptr.hbm [resolvable:$true] %s26_s16 }
   0x4   :  { %20 = dma.hbm_to_vmem [thread:$0]  %s16_s11, 32, %s18_s13, [#allocation3]  }
   0x5   :  { %s1492_s17 = smov [#allocation5]  }
   0x6   :  { %s28_s18 = sshll.u32 %s1492_s17, 4  ;;  %s29_s18 = int_to_ptr.vmem [resolvable:$true] %s28_s18 }
   0x7   :  { %31 = dma.hbm_to_vmem [thread:$0]  %s27_s16, 16, %s29_s18, [#allocation6]  }
   0x8   :  { %1485 = dma.done.wait [#allocation3], 32  }
   0x9   :  { %1486 = vsyncadd [#allocation3], 4294967264 }
   0xa   :  { %1487 = dma.done.wait [#allocation6], 16  }
   0xb   :  { %1488 = vsyncadd [#allocation6], 4294967280  ;;  %v1493_v0 = vmov 2   ;;  %v1494_v1 = vmov 0   ;;  %v40_v2 = vld [vmem:[#allocation2] sm:$0x3] }
   0xc   :  { %1409 = vset.pattern.permute.xlu1 %v1493_v0  ;;  %1407 = vset.pattern.permute.xlu0 %v1494_v1  ;;  %v1495_v3 = vmov 3   ;;  %v1496_v4 = vmov 1   ;;  %v1412_v5 = vld [vmem:[#allocation5] ss:$0 sm:$0xff]  ;;  %v1497_v34 = vmov 920167782  }
   0xd   :  { %675 = vperm.xlu1 %1409, %v40_v2   ;;  %44 = vperm.xlu0 %1407, %v40_v2   ;;  %v1498_v36 = vmov 1326507024   ;;  %v1499_v38 = vmov 2102212464   ;;  %v1500_v43 = vmov 2475754826  }
   0xe   :  { %v1501_v45 = vmov 2131351028   ;;  %v1502_v53 = vmov 683565275   ;;  %s1503_s0 = smov 80   ;;  %s1504_s1 = smov 16  }
   0xf   :  { %s1505_s19 = smov 48   ;;  %s1506_s20 = smov 32  }
  0x10   :  { %s1507_s21 = smov 64   ;;  %s1508_s22 = smov 96  }
  0x11   :  { %s1509_s23 = smov 112   ;;  %s1510_s24 = smov [#allocation7]  }
  0x12   :  { %s1350_s25 = sshll.u32 %s1510_s24, 4  ;;  %s1352_s28 = sshll.u32 %s2142_s2, 4  ;;  %s1351_s25 = int_to_ptr.vmem [resolvable:$true] %s1350_s25  ;;  %s1353_s28 = int_to_ptr.hbm [resolvable:$true] %s1352_s28 }
  0x15   :  { %1410 = vset.pattern.permute.xlu1 %v1495_v3  ;;  %1408 = vset.pattern.permute.xlu0 %v1496_v4 }
  0x16   :  { %989 = vperm.xlu1 %1410, %v40_v2   ;;  %361 = vperm.xlu0 %1408, %v40_v2  }
  0x1e   :  { %1411 = vset.pattern.permute.xlu0 %v1495_v3 }
  0x7f   :  { %v676_v6 = vpop.permute.xlu1 %675  ;;  %v45_v7 = vpop.permute.xlu0 %44 }
  0x80   :  { %v1533_v8 = vmul.f32 %v1412_v5, %v676_v6  ;;  %v1535_v9 = vmul.f32 %v1412_v5, %v45_v7 }
  0x82   :  { %v682_v10 = vand.u32 2139095040, %v1533_v8  ;;  %v54_v11 = vand.u32 2139095040, %v1535_v9  ;;  %v679_v14 = vand.u32 2147483647, %v1533_v8  ;;  %v2145_v23 = vand.u32 2147483647, %v1535_v9 }
  0x84   :  { %v683_v12 = vshrl.u32 %v682_v10, 23  ;;  %v55_v13 = vshrl.u32 %v54_v11, 23  ;;  %v686_v18 = vand.u32 8388607, %v679_v14  ;;  %v1549_v28 = vand.u32 8388607, %v2145_v23 }
  0x86   :  { %v1375_v15 = vadd.s32 4294967169, %v683_v12  ;;  %v1363_v16 = vadd.s32 4294967169, %v55_v13  ;;  %v687_v24 = vor.u32 8388608, %v686_v18  ;;  %v59_v42 = vor.u32 8388608, %v1549_v28 }
  0x88   :  { %v689_v17 = vadd.s32 1, %v1375_v15  ;;  %v61_v19 = vadd.s32 1, %v1363_v16  ;;  %v990_v21 = vpop.permute.xlu1 %989  ;;  %v362_v27 = vpop.permute.xlu0 %361  ;;  %v1551_v29 = vshll.u32 %v687_v24, 8 }
  0x89   :  { %v1543_v25 = vmul.f32 %v1412_v5, %v990_v21  ;;  %v1554_v32 = vmul.f32 %v1412_v5, %v362_v27 }
  0x8a   :  { %vm690_vm0 = vcmp.gt.s32.totalorder %v689_v17, 0  ;;  %vm62_vm1 = vcmp.gt.s32.totalorder %v61_v19, 0  ;;  %v1570_v47 = vand.u32 65535, %v1551_v29  ;;  %v1586_v61 = vshrl.u32 %v1551_v29, 16 }
  0x8b   :  { %v691_v20 = vsel %vm690_vm0, %v689_v17, 0  ;;  %v63_v30 = vsel %vm62_vm1, %v61_v19, 0  ;;  %v996_v31 = vand.u32 2139095040, %v1543_v25  ;;  %v2143_v48 = vand.u32 2147483647, %v1543_v25 }
  0x8c   :  { %v693_v22 = vand.u32 31, %v691_v20  ;;  %v1556_v33 = vshrl.u32 %v691_v20, 5  ;;  %v1564_v41 = vand.u32 31, %v63_v30  ;;  %v368_v52 = vand.u32 2139095040, %v1554_v32 }
  0x8d   :  { %v997_v51 = vshrl.u32 %v996_v31, 23  ;;  %v1588_v62 = vshrl.u32 %v63_v30, 5  ;;  %v1000_v63 = vand.u32 8388607, %v2143_v48  ;;  %v2144_v0 = vand.u32 2147483647, %v1554_v32 }
  0x8e   :  { %v1545_v26 = vsub.s32 32, %v693_v22  ;;  %v708_v35 = vshll.u32 %v1497_v34, %v693_v22  ;;  %v705_v39 = vshll.u32 %v1499_v38, %v693_v22  ;;  %v699_v44 = vshll.u32 %v1500_v43, %v693_v22 }
  0x8f   :  { %v702_v46 = vshll.u32 %v1501_v45, %v693_v22  ;;  %v696_v54 = vshll.u32 %v1502_v53, %v693_v22  ;;  %vm714_vm2 = vcmp.lt.s32.totalorder %v1556_v33, 4  ;;  %v1583_v58 = vsub.s32 32, %v1564_v41 }
  0x90   :  { %v709_v37 = vshrl.u32 %v1498_v36, %v1545_v26  ;;  %v706_v40 = vshrl.u32 %v1497_v34, %v1545_v26  ;;  %v700_v49 = vshrl.u32 %v1501_v45, %v1545_v26  ;;  %v703_v50 = vshrl.u32 %v1499_v38, %v1545_v26 }
  0x91   :  { %v697_v55 = vshrl.u32 %v1500_v43, %v1545_v26  ;;  %v1381_v59 = vadd.s32 4294967169, %v997_v51  ;;  %v369_v60 = vshrl.u32 %v368_v52, 23  ;;  %vm711_vm3 = vcmp.lt.s32.totalorder %v1556_v33, 1 }
  0x92   :  { %v710_v56 = vor.u32 %v709_v37, %v708_v35  ;;  %v707_v57 = vor.u32 %v706_v40, %v705_v39  ;;  %v1593_v2 = vor.u32 %v700_v49, %v699_v44  ;;  %v704_v3 = vor.u32 %v703_v50, %v702_v46 }
  0x93   :  { %v1003_v4 = vadd.s32 1, %v1381_v59  ;;  %v1369_v5 = vadd.s32 4294967169, %v369_v60  ;;  %v698_v6 = vor.u32 %v697_v55, %v696_v54  ;;  %vm713_vm4 = vcmp.lt.s32.totalorder %v1556_v33, 3 }
  0x94   :  { %v724_v7 = vsel %vm714_vm2, %v710_v56, 1326507024  ;;  %v720_v10 = vsel %vm714_vm2, %v707_v57, 920167782  ;;  %v78_v11 = vshrl.u32 %v1497_v34, %v1583_v58  ;;  %v77_v13 = vshll.u32 %v1499_v38, %v1564_v41 }
  0x95   :  { %vm1004_vm5 = vcmp.gt.s32.totalorder %v1003_v4, 0  ;;  %v375_v12 = vadd.s32 1, %v1369_v5  ;;  %v80_v15 = vshll.u32 %v1497_v34, %v1564_v41  ;;  %v81_v16 = vshrl.u32 %v1498_v36, %v1583_v58 }
  0x96   :  { %v1005_v17 = vsel %vm1004_vm5, %v1003_v4, 0  ;;  %v723_v18 = vsel %vm711_vm3, %v1593_v2, %v704_v3  ;;  %v725_v19 = vsel %vm713_vm4, %v707_v57, %v724_v7  ;;  %vm712_vm6 = vcmp.lt.s32.totalorder %v1556_v33, 2 }
  0x97   :  { %v1007_v20 = vand.u32 31, %v1005_v17  ;;  %v719_v21 = vsel %vm711_vm3, %v698_v6, %v1593_v2  ;;  %v721_v22 = vsel %vm713_vm4, %v704_v3, %v720_v10  ;;  %vm86_vm7 = vcmp.lt.s32.totalorder %v1588_v62, 4 }
  0x98   :  { %vm376_vm8 = vcmp.gt.s32.totalorder %v375_v12, 0  ;;  %v1621_v24 = vor.u32 %v78_v11, %v77_v13  ;;  %v1001_v27 = vor.u32 8388608, %v1000_v63  ;;  %v372_v31 = vand.u32 8388607, %v2144_v0 }
  0x99   :  { %v1008_v30 = vsub.s32 32, %v1007_v20  ;;  %v1625_v35 = vshrl.u32 %v1005_v17, 5  ;;  %v1022_v37 = vshll.u32 %v1497_v34, %v1007_v20  ;;  %v695_v39 = vshrl.u32 %v1502_v53, %v1545_v26 }
  0x9a   :  { %v726_v40 = vsel %vm712_vm6, %v723_v18, %v725_v19  ;;  %v1013_v44 = vshll.u32 %v1500_v43, %v1007_v20  ;;  %v1016_v46 = vshll.u32 %v1501_v45, %v1007_v20  ;;  %v377_v50 = vsel %vm376_vm8, %v375_v12, 0 }
  0x9b   :  { %v1017_v49 = vshrl.u32 %v1499_v38, %v1008_v30  ;;  %v1014_v51 = vshrl.u32 %v1501_v45, %v1008_v30  ;;  %v1019_v52 = vshll.u32 %v1499_v38, %v1007_v20  ;;  %v1020_v54 = vshrl.u32 %v1497_v34, %v1008_v30 }
  0x9c   :  { %v1023_v55 = vshrl.u32 %v1498_v36, %v1008_v30  ;;  %v82_v56 = vor.u32 %v81_v16, %v80_v15  ;;  %v1642_v26 = vsel %vm86_vm7, %v1621_v24, 920167782  ;;  %v373_v57 = vor.u32 8388608, %v372_v31 }
  0x9d   :  { %v731_v59 = vshrl.u32 %v726_v40, 16  ;;  %v1010_v60 = vshll.u32 %v1502_v53, %v1007_v20  ;;  %v1011_v63 = vshrl.u32 %v1500_v43, %v1008_v30  ;;  %vm1028_vm9 = vcmp.lt.s32.totalorder %v1625_v35, 4 }
  0x9e   :  { %v1024_v4 = vor.u32 %v1023_v55, %v1022_v37  ;;  %v1018_v5 = vor.u32 %v1017_v49, %v1016_v46  ;;  %v1647_v7 = vshll.u32 %v1001_v27, 8  ;;  %v379_v10 = vand.u32 31, %v377_v50 }
  0x9f   :  { %v716_v11 = vsel %vm714_vm2, %v704_v3, 2102212464  ;;  %v1015_v12 = vor.u32 %v1014_v51, %v1013_v44  ;;  %v1021_v13 = vor.u32 %v1020_v54, %v1019_v52  ;;  %v715_v15 = vsel %vm711_vm3, %v695_v39, %v698_v6 }
  0xa0   :  { %v1655_v16 = vsel %vm712_vm6, %v719_v21, %v721_v22  ;;  %vm1025_vm10 = vcmp.lt.s32.totalorder %v1625_v35, 1  ;;  %vm1027_vm11 = vcmp.lt.s32.totalorder %v1625_v35, 3  ;;  %v1038_v17 = vsel %vm1028_vm9, %v1024_v4, 1326507024 }
  0xa1   :  { %v1661_v18 = vshll.u32 %v373_v57, 8  ;;  %v1009_v3 = vshrl.u32 %v1502_v53, %v1008_v30  ;;  %v1012_v19 = vor.u32 %v1011_v63, %v1010_v60  ;;  %v717_v6 = vsel %vm713_vm4, %v1593_v2, %v716_v11 }
  0xa2   :  { %v1668_v20 = vmul.u32 %v731_v59, %v1570_v47  ;;  %v1672_v21 = vsel %vm86_vm7, %v82_v56, 1326507024  ;;  %v1030_v22 = vsel %vm1028_vm9, %v1018_v5, 2102212464  ;;  %v1676_v27 = vsub.s32 32, %v379_v10 }
  0xa3   :  { %v730_v31 = vand.u32 65535, %v726_v40  ;;  %vm1026_vm12 = vcmp.lt.s32.totalorder %v1625_v35, 2  ;;  %v1034_v30 = vsel %vm1028_vm9, %v1021_v13, 920167782  ;;  %v1037_v2 = vsel %vm1025_vm10, %v1015_v12, %v1018_v5 }
  0xa4   :  { %v1039_v37 = vsel %vm1027_vm11, %v1021_v13, %v1038_v17  ;;  %v1686_v39 = vand.u32 65535, %v1647_v7  ;;  %v1689_v44 = vshrl.u32 %v1647_v7, 16  ;;  %v1693_v40 = vsel %vm712_vm6, %v715_v15, %v717_v6 }
  0xa5   :  { %v752_v46 = vand.u32 65535, %v1655_v16  ;;  %v1029_v49 = vsel %vm1025_vm10, %v1009_v3, %v1012_v19  ;;  %v1031_v51 = vsel %vm1027_vm11, %v1015_v12, %v1030_v22  ;;  %v1701_v52 = vand.u32 65535, %v1661_v18 }
  0xa6   :  { %v736_v54 = vshll.u32 %v1668_v20, 16  ;;  %v1033_v55 = vsel %vm1025_vm10, %v1012_v19, %v1015_v12  ;;  %v1035_v33 = vsel %vm1027_vm11, %v1018_v5, %v1034_v30  ;;  %v1710_v56 = vsel %vm1026_vm12, %v1037_v2, %v1039_v37 }
  0xa7   :  { %v383_v57 = vshrl.u32 %v1500_v43, %v1676_v27  ;;  %v1715_v60 = vshrl.u32 %v1661_v18, 16  ;;  %v732_v63 = vmul.u32 %v730_v31, %v1570_v47  ;;  %v1719_v4 = vmul.u32 %v730_v31, %v1586_v61 }
  0xa8   :  { %v735_v11 = vmul.u32 %v731_v59, %v1586_v61  ;;  %v1724_v5 = vsel %vm1026_vm12, %v1029_v49, %v1031_v51  ;;  %v1726_v12 = vshrl.u32 %v377_v50, 5  ;;  %v382_v13 = vshll.u32 %v1502_v53, %v379_v10 }
  0xa9   :  { %v386_v15 = vshrl.u32 %v1501_v45, %v1676_v27  ;;  %v1733_v17 = vsel %vm1026_vm12, %v1033_v55, %v1035_v33  ;;  %v1044_v3 = vand.u32 65535, %v1710_v56  ;;  %v1045_v19 = vshrl.u32 %v1710_v56, 16 }
  0xaa   :  { %v389_v59 = vshrl.u32 %v1499_v38, %v1676_v27  ;;  %v1739_v6 = vor.u32 %v383_v57, %v382_v13  ;;  %v385_v50 = vshll.u32 %v1500_v43, %v379_v10  ;;  %v392_v22 = vshrl.u32 %v1497_v34, %v1676_v27 }
  0xab   :  { %vm740_vm13 = vc.u32 %v732_v63, %v736_v54  ;;  %v388_v31 = vshll.u32 %v1501_v45, %v379_v10  ;;  %v738_v35 = vshll.u32 %v1719_v4, 16  ;;  %v742_v2 = vadd.s32 %v736_v54, %v732_v63 }
  0xac   :  { %v741_v30 = vsel %vm740_vm13, 1, %v1494_v1  ;;  %v1747_v37 = vor.u32 %v386_v15, %v385_v50  ;;  %v391_v49 = vshll.u32 %v1499_v38, %v379_v10  ;;  %v753_v55 = vshrl.u32 %v1655_v16, 16 }
  0xad   :  { %v743_v51 = vadd.s32 %v741_v30, %v735_v11  ;;  %v1751_v33 = vor.u32 %v389_v59, %v388_v31  ;;  %v394_v57 = vshll.u32 %v1497_v34, %v379_v10  ;;  %v395_v13 = vshrl.u32 %v1498_v36, %v1676_v27 }
  0xae   :  { %vm744_vm14 = vc.u32 %v742_v2, %v738_v35  ;;  %v1756_v48 = vor.u32 %v392_v22, %v391_v49  ;;  %v755_v54 = vmul.u32 %v753_v55, %v1570_v47  ;;  %v756_v63 = vmul.u32 %v752_v46, %v1586_v61 }
  0xaf   :  { %v745_v0 = vsel %vm744_vm14, 1, %v1494_v1  ;;  %v737_v11 = vshrl.u32 %v1668_v20, 16  ;;  %v68_v16 = vshll.u32 %v1502_v53, %v1564_v41  ;;  %v69_v34 = vshrl.u32 %v1500_v43, %v1583_v58 }
  0xb0   :  { %v747_v15 = vadd.s32 %v745_v0, %v743_v51  ;;  %v754_v36 = vmul.u32 %v752_v46, %v1570_v47  ;;  %v758_v10 = vshll.u32 %v755_v54, 16  ;;  %v71_v59 = vshll.u32 %v1500_v43, %v1564_v41 }
  0xb1   :  { %v72_v50 = vshrl.u32 %v1501_v45, %v1583_v58  ;;  %vm400_vm15 = vcmp.lt.s32.totalorder %v1726_v12, 4  ;;  %v757_v20 = vmul.u32 %v753_v55, %v1586_v61  ;;  %v1773_v0 = vor.u32 %v69_v34, %v68_v16 }
  0xb2   :  { %v74_v22 = vshll.u32 %v1501_v45, %v1564_v41  ;;  %v75_v31 = vshrl.u32 %v1499_v38, %v1583_v58  ;;  %vm397_vm0 = vcmp.lt.s32.totalorder %v1726_v12, 1  ;;  %v760_v47 = vshll.u32 %v756_v63, 16 }
  0xb3   :  { %vm762_vm1 = vc.u32 %v754_v36, %v758_v10  ;;  %v764_v43 = vadd.s32 %v758_v10, %v754_v36  ;;  %v1780_v46 = vor.u32 %v72_v50, %v71_v59  ;;  %v396_v35 = vor.u32 %v395_v13, %v394_v57 }
  0xb4   :  { %v748_v30 = vadd.s32 %v747_v15, %v737_v11  ;;  %v763_v2 = vsel %vm762_vm1, 1, %v1494_v1  ;;  %v1783_v61 = vor.u32 %v75_v31, %v74_v22  ;;  %vm83_vm3 = vcmp.lt.s32.totalorder %v1588_v62, 1 }
  0xb5   :  { %v765_v49 = vadd.s32 %v763_v2, %v757_v20  ;;  %vm766_vm2 = vc.u32 %v764_v43, %v760_v47  ;;  %vm85_vm4 = vcmp.lt.s32.totalorder %v1588_v62, 3  ;;  %v739_v38 = vshrl.u32 %v1719_v4, 16 }
  0xb6   :  { %v767_v41 = vsel %vm766_vm2, 1, %v1494_v1  ;;  %v91_v45 = vsel %vm83_vm3, %v1773_v0, %v1780_v46  ;;  %v93_v51 = vsel %vm85_vm4, %v1783_v61, %v1642_v26  ;;  %v759_v55 = vshrl.u32 %v755_v54, 16 }
  0xb7   :  { %v761_v57 = vshrl.u32 %v756_v63, 16  ;;  %v769_v13 = vadd.s32 %v767_v41, %v765_v49  ;;  %vm84_vm5 = vcmp.lt.s32.totalorder %v1588_v62, 2  ;;  %v1798_v11 = vadd.s32 %v748_v30, %v739_v38 }
  0xb8   :  { %v94_v4 = vsel %vm84_vm5, %v91_v45, %v93_v51  ;;  %v95_v15 = vsel %vm83_vm3, %v1780_v46, %v1783_v61  ;;  %v97_v26 = vsel %vm85_vm4, %v1621_v24, %v1672_v21  ;;  %v1810_v54 = vadd.s32 %v764_v43, %v760_v47 }
  0xb9   :  { %v770_v63 = vadd.s32 %v769_v13, %v759_v55  ;;  %v98_v16 = vsel %vm84_vm5, %v95_v15, %v97_v26  ;;  %v1816_v34 = vshll.u32 %v59_v42, 8  ;;  %v124_v59 = vand.u32 65535, %v94_v4 }
  0xba   :  { %v102_v36 = vand.u32 65535, %v98_v16  ;;  %v103_v10 = vshrl.u32 %v98_v16, 16  ;;  %v125_v50 = vshrl.u32 %v94_v4, 16  ;;  %v406_v20 = vsel %vm400_vm15, %v1756_v48, 920167782 }
  0xbb   :  { %v771_v22 = vadd.s32 %v770_v63, %v761_v57  ;;  %v100_v24 = vand.u32 65535, %v1816_v34  ;;  %v101_v21 = vshrl.u32 %v1816_v34, 16  ;;  %vm399_vm6 = vcmp.lt.s32.totalorder %v1726_v12, 3 }
  0xbc   :  { %v405_v28 = vsel %vm397_vm0, %v1739_v6, %v1747_v37  ;;  %v410_v42 = vsel %vm400_vm15, %v396_v35, 1326507024  ;;  %vm774_vm8 = vc.u32 %v1798_v11, %v1810_v54  ;;  %v409_v31 = vsel %vm397_vm0, %v1747_v37, %v1751_v33 }
  0xbd   :  { %v775_v47 = vadd.s32 1, %v771_v22  ;;  %v105_v43 = vmul.u32 %v103_v10, %v100_v24  ;;  %v106_v30 = vmul.u32 %v102_v36, %v101_v21  ;;  %v407_v2 = vsel %vm399_vm6, %v1751_v33, %v406_v20 }
  0xbe   :  { %v772_v49 = vmul.u32 %v1551_v29, %v1693_v40  ;;  %v127_v38 = vmul.u32 %v125_v50, %v100_v24  ;;  %v128_v35 = vmul.u32 %v124_v59, %v101_v21  ;;  %v411_v41 = vsel %vm399_vm6, %v1756_v48, %v410_v42 }
  0xbf   :  { %v776_v45 = vsel %vm774_vm8, %v775_v47, %v771_v22  ;;  %v104_v51 = vmul.u32 %v102_v36, %v100_v24  ;;  %v108_v55 = vshll.u32 %v105_v43, 16  ;;  %v107_v13 = vmul.u32 %v103_v10, %v101_v21 }
  0xc0   :  { %v777_v57 = vadd.s32 %v776_v45, %v772_v49  ;;  %v126_v4 = vmul.u32 %v124_v59, %v100_v24  ;;  %v130_v15 = vshll.u32 %v127_v38, 16  ;;  %v110_v26 = vshll.u32 %v106_v30, 16 }
  0xc1   :  { %vm112_vm9 = vc.u32 %v104_v51, %v108_v55  ;;  %v114_v63 = vadd.s32 %v108_v55, %v104_v51  ;;  %v129_v16 = vmul.u32 %v125_v50, %v101_v21  ;;  %v132_v40 = vshll.u32 %v128_v35, 16 }
  0xc2   :  { %v778_v20 = vadd.s32 536870912, %v777_v57  ;;  %v113_v29 = vsel %vm112_vm9, 1, %v1494_v1  ;;  %vm134_vm10 = vc.u32 %v126_v4, %v130_v15  ;;  %v136_v22 = vadd.s32 %v130_v15, %v126_v4 }
  0xc3   :  { %v115_v23 = vadd.s32 %v113_v29, %v107_v13  ;;  %vm116_vm11 = vc.u32 %v114_v63, %v110_v26  ;;  %v135_v48 = vsel %vm134_vm10, 1, %v1494_v1  ;;  %v67_v10 = vshrl.u32 %v1502_v53, %v1583_v58 }
  0xc4   :  { %v1846_v36 = vshrl.u32 %v778_v20, 30  ;;  %v117_v59 = vsel %vm116_vm11, 1, %v1494_v1  ;;  %v137_v24 = vadd.s32 %v135_v48, %v129_v16  ;;  %v88_v50 = vsel %vm86_vm7, %v1783_v61, 2102212464 }
  0xc5   :  { %v109_v21 = vshrl.u32 %v105_v43, 16  ;;  %v119_v42 = vadd.s32 %v117_v59, %v115_v23  ;;  %vm138_vm12 = vc.u32 %v136_v22, %v132_v40  ;;  %v111_v49 = vshrl.u32 %v106_v30, 16 }
  0xc6   :  { %v780_v47 = vshll.u32 %v1846_v36, 30  ;;  %v139_v45 = vsel %vm138_vm12, 1, %v1494_v1  ;;  %vm398_vm13 = vcmp.lt.s32.totalorder %v1726_v12, 2  ;;  %v131_v55 = vshrl.u32 %v127_v38, 16 }
  0xc7   :  { %v120_v51 = vadd.s32 %v119_v42, %v109_v21  ;;  %v141_v58 = vadd.s32 %v139_v45, %v137_v24  ;;  %v412_v13 = vsel %vm398_vm13, %v409_v31, %v411_v41  ;;  %v87_v23 = vsel %vm83_vm3, %v67_v10, %v1773_v0 }
  0xc8   :  { %v1859_v4 = vsub.s32 %v777_v57, %v780_v47  ;;  %v89_v61 = vsel %vm85_vm4, %v1780_v46, %v88_v50  ;;  %v417_v43 = vshrl.u32 %v412_v13, 16  ;;  %v133_v15 = vshrl.u32 %v128_v35, 16 }
  0xc9   :  { %v1867_v30 = vadd.s32 %v120_v51, %v111_v49  ;;  %v142_v26 = vadd.s32 %v141_v58, %v131_v55  ;;  %v416_v38 = vand.u32 65535, %v412_v13  ;;  %v1871_v41 = vadd.s32 %v136_v22, %v132_v40 }
  0xca   :  { %vm782_vm7 = vcmp.lt.s32.totalorder %v1859_v4, 0  ;;  %v783_v31 = vsub.s32 0, %v1859_v4  ;;  %v408_v57 = vsel %vm398_vm13, %v405_v28, %v407_v2  ;;  %v1066_v0 = vand.u32 65535, %v1733_v17 }
  0xcb   :  { %v90_v46 = vsel %vm84_vm5, %v87_v23, %v89_v61  ;;  %v143_v63 = vadd.s32 %v142_v26, %v133_v15  ;;  %v1879_v16 = vmul.u32 %v417_v43, %v1701_v52  ;;  %v1884_v35 = vmul.u32 %v1044_v3, %v1686_v39 }
  0xcc   :  { %v1067_v20 = vshrl.u32 %v1733_v17, 16  ;;  %v784_v29 = vsel %vm782_vm7, %v783_v31, %v1859_v4  ;;  %vm146_vm14 = vc.u32 %v1867_v30, %v1871_v41  ;;  %v1891_v62 = vmul.u32 %v416_v38, %v1715_v60 }
  0xcd   :  { %v785_v28 = vclz %v784_v29  ;;  %v147_v2 = vadd.s32 1, %v143_v63  ;;  %v438_v40 = vand.u32 65535, %v408_v57  ;;  %v144_v48 = vmul.u32 %v1816_v34, %v90_v46 }
  0xce   :  { %v418_v22 = vmul.u32 %v416_v38, %v1701_v52  ;;  %v422_v10 = vshll.u32 %v1879_v16, 16  ;;  %v439_v59 = vshrl.u32 %v408_v57, 16  ;;  %v421_v21 = vmul.u32 %v417_v43, %v1715_v60 }
  0xcf   :  { %v1376_v24 = vadd.s32 4294967294, %v785_v28  ;;  %v148_v50 = vsel %vm146_vm14, %v147_v2, %v143_v63  ;;  %v424_v42 = vshll.u32 %v1891_v62, 16  ;;  %vm681_vm2 = vcmp.lt.s32.totalorder %v1533_v8, 0 }
  0xd0   :  { %v149_v47 = vadd.s32 %v148_v50, %v144_v48  ;;  %vm426_vm1 = vc.u32 %v418_v22, %v422_v10  ;;  %v428_v49 = vadd.s32 %v422_v10, %v418_v22  ;;  %v1899_v45 = vmul.u32 %v439_v59, %v1701_v52 }
  0xd1   :  { %v1905_v34 = vmul.u32 %v1045_v19, %v1686_v39  ;;  %vm1377_vm3 = vcmp.lt.s32.totalorder %v1376_v24, 0  ;;  %v427_v51 = vsel %vm426_vm1, 1, %v1494_v1  ;;  %v1909_v55 = vmul.u32 %v438_v40, %v1715_v60 }
  0xd2   :  { %v788_v58 = vsel %vm1377_vm3, 0, %v1376_v24  ;;  %v150_v13 = vadd.s32 536870912, %v149_v47  ;;  %v429_v23 = vadd.s32 %v427_v51, %v421_v21  ;;  %vm430_vm4 = vc.u32 %v428_v49, %v424_v42 }
  0xd3   :  { %v773_v61 = vadd.s32 %v1810_v54, %v1798_v11  ;;  %v789_v43 = vsub.s32 32, %v788_v58  ;;  %v793_v15 = vsub.s32 4294967266, %v788_v58  ;;  %v431_v26 = vsel %vm430_vm4, 1, %v1494_v1 }
  0xd4   :  { %v803_v38 = vsub.s32 4, %v1846_v36  ;;  %v1915_v31 = vshrl.u32 %v150_v13, 30  ;;  %v440_v57 = vmul.u32 %v438_v40, %v1701_v52  ;;  %v444_v46 = vshll.u32 %v1899_v45, 16 }
  0xd5   :  { %vm1921_vm5 = vcmp.le.f32.partialorder %v679_v14, 0.7853982  ;;  %v790_v11 = vshll.u32 %v1859_v4, %v788_v58  ;;  %v791_v54 = vshrl.u32 %v773_v61, %v789_v43  ;;  %v794_v29 = vadd.s32 127, %v793_v15 }
  0xd6   :  { %v443_v28 = vmul.u32 %v439_v59, %v1715_v60  ;;  %v152_v2 = vshll.u32 %v1915_v31, 30  ;;  %v433_v48 = vadd.s32 %v431_v26, %v429_v23  ;;  %v446_v22 = vshll.u32 %v1909_v55, 16 }
  0xd7   :  { %vm448_vm8 = vc.u32 %v440_v57, %v444_v46  ;;  %v792_v52 = vor.u32 %v791_v54, %v790_v11  ;;  %v795_v40 = vshll.u32 %v794_v29, 23  ;;  %v450_v14 = vadd.s32 %v444_v46, %v440_v57 }
  0xd8   :  { %v449_v10 = vsel %vm448_vm8, 1, %v1494_v1  ;;  %v1933_v24 = vmul.u32 %v1045_v19, %v1689_v44  ;;  %v1050_v4 = vshll.u32 %v1905_v34, 16  ;;  %v153_v50 = vsub.s32 %v149_v47, %v152_v2 }
  0xd9   :  { %v402_v60 = vsel %vm400_vm15, %v1751_v33, 2102212464  ;;  %v796_v59 = vor.u32 4788187, %v795_v40  ;;  %v423_v21 = vshrl.u32 %v1879_v16, 16  ;;  %v451_v42 = vadd.s32 %v449_v10, %v443_v28 }
  0xda   :  { %vm452_vm9 = vc.u32 %v450_v14, %v446_v22  ;;  %v804_v49 = vsel %vm681_vm2, %v803_v38, %v1846_v36  ;;  %vm154_vm10 = vcmp.lt.s32.totalorder %v153_v50, 0  ;;  %v155_v51 = vsub.s32 0, %v153_v50 }
  0xdb   :  { %v381_v19 = vshrl.u32 %v1502_v53, %v1676_v27  ;;  %v797_v58 = vand.u32 2147483647, %v796_v59  ;;  %v799_v47 = vcvt.s32.f32 %v792_v52  ;;  %v434_v13 = vadd.s32 %v433_v48, %v423_v21 }
  0xdc   :  { %v453_v23 = vsel %vm452_vm9, 1, %v1494_v1  ;;  %v156_v33 = vsel %vm154_vm10, %v155_v51, %v153_v50  ;;  %v403_v61 = vsel %vm399_vm6, %v1747_v37, %v402_v60  ;;  %v425_v36 = vshrl.u32 %v1891_v62, 16 }
  0xdd   :  { %v401_v16 = vsel %vm397_vm0, %v381_v19, %v1739_v6  ;;  %v800_v43 = vmul.f32 %v799_v47, %v797_v58  ;;  %v157_v15 = vclz %v156_v33  ;;  %v445_v53 = vshrl.u32 %v1899_v45, 16 }
  0xde   :  { %v455_v27 = vadd.s32 %v453_v23, %v451_v42  ;;  %v1957_v26 = vmul.u32 %v1067_v20, %v1686_v39  ;;  %v1962_v6 = vmul.u32 %v1067_v20, %v1689_v44  ;;  %v1966_v37 = vsel %vm1921_vm5, 0, %v804_v49 }
  0xdf   :  { %v447_v62 = vshrl.u32 %v1909_v55, 16  ;;  %v801_v38 = vxor.u32 2147483648, %v800_v43  ;;  %v1364_v57 = vadd.s32 4294967294, %v157_v15  ;;  %v1969_v45 = vadd.s32 %v434_v13, %v425_v36 }
  0xe0   :  { %v456_v46 = vadd.s32 %v455_v27, %v445_v53  ;;  %vm1972_vm15 = vc.u32 %v1884_v35, %v1050_v4  ;;  %v1056_v54 = vadd.s32 %v1050_v4, %v1884_v35  ;;  %v404_v20 = vsel %vm398_vm13, %v401_v16, %v403_v61 }
  0xe1   :  { %v1982_v29 = vmul.u32 %v1044_v3, %v1689_v44  ;;  %v802_v55 = vsel %vm681_vm2, %v801_v38, %v800_v43  ;;  %vm1365_vm0 = vcmp.lt.s32.totalorder %v1364_v57, 0  ;;  %v1986_v28 = vadd.s32 %v450_v14, %v446_v22 }
  0xe2   :  { %v457_v2 = vadd.s32 %v456_v46, %v447_v62  ;;  %v1991_v48 = vsel %vm1921_vm5, %v1533_v8, %v802_v55  ;;  %v1994_v12 = vand.u32 3, %v1966_v37  ;;  %v145_v56 = vadd.s32 %v1871_v41, %v1867_v30 }
  0xe3   :  { %v160_v3 = vsel %vm1365_vm0, 0, %v1364_v57  ;;  %v807_v35 = vmul.f32 %v1991_v48, %v1991_v48  ;;  %vm460_vm6 = vc.u32 %v1969_v45, %v1986_v28  ;;  %v1052_v63 = vshll.u32 %v1982_v29, 16 }
  0xe4   :  { %v161_v52 = vsub.s32 32, %v160_v3  ;;  %v165_v40 = vsub.s32 4294967266, %v160_v3  ;;  %v162_v22 = vshll.u32 %v153_v50, %v160_v3  ;;  %v461_v10 = vadd.s32 1, %v457_v2 }
  0xe5   :  { %v1055_v14 = vsel %vm1972_vm15, 1, %v1494_v1  ;;  %v808_v4 = vmul.f32 -0.001358992, %v807_v35  ;;  %v815_v60 = vmul.f32 -0.00019511016, %v807_v35  ;;  %v458_v59 = vmul.u32 %v1661_v18, %v404_v20 }
  0xe6   :  { %v163_v30 = vshrl.u32 %v145_v56, %v161_v52  ;;  %v166_v41 = vadd.s32 127, %v165_v40  ;;  %v462_v21 = vsel %vm460_vm6, %v461_v10, %v457_v2  ;;  %vm1058_vm11 = vc.u32 %v1056_v54, %v1052_v63 }
  0xe7   :  { %v1072_v42 = vshll.u32 %v1957_v26, 16  ;;  %v809_v49 = vadd.f32 0.041655596, %v808_v4  ;;  %v816_v51 = vadd.f32 0.008332121, %v815_v60  ;;  %vm53_vm12 = vcmp.lt.s32.totalorder %v1535_v9, 0 }
  0xe8   :  { %v164_v50 = vor.u32 %v163_v30, %v162_v22  ;;  %v167_v19 = vshll.u32 %v166_v41, 23  ;;  %v463_v58 = vadd.s32 %v462_v21, %v458_v59  ;;  %v1057_v47 = vadd.s32 %v1055_v14, %v1933_v24 }
  0xe9   :  { %v1068_v13 = vmul.u32 %v1066_v0, %v1686_v39  ;;  %v2016_v18 = vmul.u32 %v1066_v0, %v1689_v44  ;;  %v810_v23 = vmul.f32 %v809_v49, %v807_v35  ;;  %v817_v33 = vmul.f32 %v816_v51, %v807_v35 }
  0xea   :  { %v2150_v16 = vand.u32 2147483647, %v1535_v9  ;;  %v168_v36 = vor.u32 4788187, %v167_v19  ;;  %v1059_v24 = vsel %vm1058_vm11, 1, %v1494_v1  ;;  %v171_v43 = vcvt.s32.f32 %v164_v50 }
  0xeb   :  { %v175_v15 = vsub.s32 4, %v1915_v31  ;;  %v464_v39 = vadd.s32 536870912, %v463_v58  ;;  %vm1076_vm7 = vc.u32 %v1068_v13, %v1072_v42  ;;  %v811_v53 = vadd.f32 -0.4999988, %v810_v23 }
  0xec   :  { %vm2020_vm13 = vcmp.le.f32.partialorder %v2150_v16, 0.7853982  ;;  %v818_v17 = vadd.f32 -0.16666654, %v817_v33  ;;  %v169_v44 = vand.u32 2147483647, %v168_v36  ;;  %v1078_v0 = vadd.s32 %v1072_v42, %v1068_v13 }
  0xed   :  { %v2026_v27 = vshrl.u32 %v464_v39, 30  ;;  %v1061_v62 = vadd.s32 %v1059_v24, %v1057_v47  ;;  %v1074_v38 = vshll.u32 %v2016_v18, 16  ;;  %v1077_v57 = vsel %vm1076_vm7, 1, %v1494_v1 }
  0xee   :  { %v812_v46 = vmul.f32 %v811_v53, %v807_v35  ;;  %v819_v11 = vmul.f32 %v818_v17, %v807_v35  ;;  %vm979_vm14 = vcmp.lt.s32.totalorder %v1994_v12, 2  ;;  %v172_v54 = vmul.f32 %v171_v43, %v169_v44 }
  0xef   :  { %vm822_vm1 = vweird.f32 %v1533_v8  ;;  %v466_v20 = vshll.u32 %v2026_v27, 30  ;;  %v1051_v55 = vshrl.u32 %v1905_v34, 16  ;;  %v1079_v2 = vadd.s32 %v1077_v57, %v1962_v6 }
  0xf0   :  { %vm1080_vm2 = vc.u32 %v1078_v0, %v1074_v38  ;;  %v2035_v56 = vadd.f32 1.0, %v812_v46  ;;  %v820_v3 = vadd.f32 1.0, %v819_v11  ;;  %v173_v52 = vxor.u32 2147483648, %v172_v54 }
  0xf1   :  { %v1081_v40 = vsel %vm1080_vm2, 1, %v1494_v1  ;;  %vm980_vm3 = vcmp.eq.s32.totalorder %v1994_v12, 0  ;;  %v176_v35 = vsel %vm53_vm12, %v175_v15, %v1915_v31  ;;  %v467_v22 = vsub.s32 %v463_v58, %v466_v20 }
  0xf2   :  { %v1062_v10 = vadd.s32 %v1061_v62, %v1051_v55  ;;  %v2043_v63 = vmul.f32 %v820_v3, %v1991_v48  ;;  %v830_v34 = vxor.u32 2147483648, %v2035_v56  ;;  %v174_v6 = vsel %vm53_vm12, %v173_v52, %v172_v54 }
  0xf3   :  { %v1053_v14 = vshrl.u32 %v1982_v29, 16  ;;  %v177_v1 = vsel %vm2020_vm13, %v1535_v9, %v174_v6  ;;  %vm468_vm4 = vcmp.lt.s32.totalorder %v467_v22, 0  ;;  %v469_v4 = vsub.s32 0, %v467_v22 }
  0xf4   :  { %v1083_v60 = vadd.s32 %v1081_v40, %v1079_v2  ;;  %v827_v31 = vxor.u32 2147483648, %v2043_v63  ;;  %vm983_vm5 = vcmp.eq.s32.totalorder %v1994_v12, 2  ;;  %v178_v48 = vsel %vm2020_vm13, 0, %v176_v35 }
  0xf5   :  { %v179_v30 = vmul.f32 %v177_v1, %v177_v1  ;;  %v985_v41 = vsel %vm983_vm5, %v830_v34, %v2043_v63  ;;  %v470_v29 = vsel %vm468_vm4, %v469_v4, %v467_v22  ;;  %v2059_v59 = vadd.s32 %v1062_v10, %v1053_v14 }
  0xf6   :  { %v1073_v21 = vshrl.u32 %v1957_v26, 16  ;;  %v982_v42 = vsel %vm980_vm3, %v2035_v56, %v827_v31  ;;  %v471_v50 = vclz %v470_v29  ;;  %v1075_v58 = vshrl.u32 %v2016_v18, 16 }
  0xf7   :  { %v180_v49 = vmul.f32 -0.001358992, %v179_v30  ;;  %v187_v51 = vmul.f32 -0.00019511016, %v179_v30  ;;  %v986_v19 = vsel %vm979_vm14, %v982_v42, %v985_v41  ;;  %v2070_v47 = vadd.s32 %v1078_v0, %v1074_v38 }
  0xf8   :  { %v1084_v13 = vadd.s32 %v1083_v60, %v1073_v21  ;;  %v987_v26 = vsel %vm822_vm1, nan, %v986_v19  ;;  %v1370_v16 = vadd.s32 4294967294, %v471_v50  ;;  %v1086_v12 = vmul.u32 %v1647_v7, %v1724_v5 }
  0xf9   :  { %v181_v23 = vadd.f32 0.041655596, %v180_v49  ;;  %v188_v33 = vadd.f32 0.008332121, %v187_v51  ;;  %1319 = vrot.lane.b32.xlu0 %v987_v26, %s1503_s0  ;;  %vm1088_vm9 = vc.u32 %v2059_v59, %v2070_v47  ;;  %v195_v18 = vadd.s32 3, %v178_v48 }
  0xfa   :  { %v1085_v61 = vadd.s32 %v1084_v13, %v1075_v58  ;;  %vm1371_vm8 = vcmp.lt.s32.totalorder %v1370_v16, 0  ;;  %v459_v17 = vadd.s32 %v1986_v28, %v1969_v45  ;;  %v350_v20 = vand.u32 3, %v178_v48 }
  0xfb   :  { %v182_v36 = vmul.f32 %v181_v23, %v179_v30  ;;  %v189_v24 = vmul.f32 %v188_v33, %v179_v30  ;;  %v474_v43 = vsel %vm1371_vm8, 0, %v1370_v16  ;;  %v196_v54 = vand.u32 3, %v195_v18 }
  0xfc   :  { %v1089_v15 = vadd.s32 1, %v1085_v61  ;;  %v475_v44 = vsub.s32 32, %v474_v43  ;;  %v479_v0 = vsub.s32 4294967266, %v474_v43  ;;  %v476_v55 = vshll.u32 %v467_v22, %v474_v43 }
  0xfd   :  { %v183_v39 = vadd.f32 -0.4999988, %v182_v36  ;;  %v190_v53 = vadd.f32 -0.16666654, %v189_v24  ;;  %vm201_vm10 = vcmp.eq.s32.totalorder %v196_v54, 2  ;;  %vm351_vm15 = vcmp.lt.s32.totalorder %v350_v20, 2 }
  0xfe   :  { %v1090_v62 = vsel %vm1088_vm9, %v1089_v15, %v1085_v61  ;;  %v477_v46 = vshrl.u32 %v459_v17, %v475_v44  ;;  %v480_v2 = vadd.s32 127, %v479_v0  ;;  %vm352_vm0 = vcmp.eq.s32.totalorder %v350_v20, 0 }
  0xff   :  { %v184_v38 = vmul.f32 %v183_v39, %v179_v30  ;;  %v191_v57 = vmul.f32 %v190_v53, %v179_v30  ;;  %v1091_v11 = vadd.s32 %v1090_v62, %v1086_v12  ;;  %vm355_vm6 = vcmp.eq.s32.totalorder %v350_v20, 2 }
 0x100   :  { %v478_v52 = vor.u32 %v477_v46, %v476_v55  ;;  %v481_v40 = vshll.u32 %v480_v2, 23  ;;  %vm197_vm11 = vcmp.lt.s32.totalorder %v196_v54, 2  ;;  %vm198_vm12 = vcmp.eq.s32.totalorder %v196_v54, 0 }
 0x101   :  { %v185_v7 = vadd.f32 1.0, %v184_v38  ;;  %v192_v5 = vadd.f32 1.0, %v191_v57  ;;  %v1092_v3 = vadd.s32 536870912, %v1091_v11  ;;  %vm194_vm13 = vweird.f32 %v1535_v9 }
 0x102   :  { %v482_v45 = vor.u32 4788187, %v481_v40  ;;  %v485_v60 = vcvt.s32.f32 %v478_v52  ;;  %vm367_vm14 = vcmp.lt.s32.totalorder %v1554_v32, 0  ;;  %v2153_v13 = vand.u32 2147483647, %v1554_v32 }
 0x103   :  { %v193_v35 = vmul.f32 %v192_v5, %v177_v1  ;;  %v202_v10 = vxor.u32 2147483648, %v185_v7  ;;  %v2080_v6 = vshrl.u32 %v1092_v3, 30  ;;  %v489_v23 = vsub.s32 4, %v2026_v27 }
 0x104   :  { %v483_v22 = vand.u32 2147483647, %v482_v45  ;;  %vm2090_vm2 = vcmp.le.f32.partialorder %v2153_v13, 0.7853982  ;;  %v1087_v53 = vadd.s32 %v2070_v47, %v2059_v59  ;;  %v823_v45 = vadd.s32 3, %v1966_v37 }
 0x105   :  { %v199_v28 = vxor.u32 2147483648, %v193_v35  ;;  %v203_v14 = vsel %vm201_vm10, %v202_v10, %v193_v35  ;;  %v1094_v4 = vshll.u32 %v2080_v6, 30  ;;  %v357_v30 = vsel %vm355_vm6, %v202_v10, %v193_v35 }
 0x106   :  { %v486_v42 = vmul.f32 %v485_v60, %v483_v22  ;;  %v490_v24 = vsel %vm367_vm14, %v489_v23, %v2026_v27  ;;  %vm995_vm4 = vcmp.lt.s32.totalorder %v1543_v25, 0  ;;  %vm508_vm5 = vweird.f32 %v1554_v32 }
 0x107   :  { %v354_v48 = vsel %vm352_vm0, %v185_v7, %v199_v28  ;;  %v200_v41 = vsel %vm198_vm12, %v185_v7, %v199_v28  ;;  %v1095_v1 = vsub.s32 %v1091_v11, %v1094_v4  ;;  %v492_v44 = vsel %vm2090_vm2, 0, %v490_v24 }
 0x108   :  { %v358_v29 = vsel %vm351_vm15, %v354_v48, %v357_v30  ;;  %v204_v21 = vsel %vm197_vm11, %v200_v41, %v203_v14  ;;  %v487_v19 = vxor.u32 2147483648, %v486_v42  ;;  %v509_v20 = vadd.s32 3, %v492_v44 }
 0x109   :  { %v359_v49 = vsel %vm194_vm13, nan, %v358_v29  ;;  %v2085_v51 = vsel %vm194_vm13, nan, %v204_v21  ;;  %vm1096_vm7 = vcmp.lt.s32.totalorder %v1095_v1, 0  ;;  %v1097_v50 = vsub.s32 0, %v1095_v1 }
 0x10a   :  { %1303 = vrot.lane.b32.xlu2 %v359_v49, %s1504_s1  ;;  %v488_v9 = vsel %vm367_vm14, %v487_v19, %v486_v42  ;;  %v664_v3 = vand.u32 3, %v492_v44  ;;  %v510_v40 = vand.u32 3, %v509_v20  ;;  %v824_v48 = vand.u32 3, %v823_v45 }
 0x10b   :  { %v1098_v58 = vsel %vm1096_vm7, %v1097_v50, %v1095_v1  ;;  %v491_v16 = vsel %vm2090_vm2, %v1554_v32, %v488_v9  ;;  %v2156_v42 = vand.u32 2147483647, %v1543_v25  ;;  %v1117_v13 = vsub.s32 4, %v2080_v6 }
 0x10c   :  { %v1099_v33 = vclz %v1098_v58  ;;  %v493_v61 = vmul.f32 %v491_v16, %v491_v16  ;;  %vm665_vm8 = vcmp.lt.s32.totalorder %v664_v3, 2  ;;  %vm666_vm9 = vcmp.eq.s32.totalorder %v664_v3, 0 }
 0x10d   :  { %vm669_vm10 = vcmp.eq.s32.totalorder %v664_v3, 2  ;;  %vm511_vm15 = vcmp.lt.s32.totalorder %v510_v40, 2  ;;  %vm512_vm0 = vcmp.eq.s32.totalorder %v510_v40, 0  ;;  %vm515_vm6 = vcmp.eq.s32.totalorder %v510_v40, 2 }
 0x10e   :  { %v1382_v36 = vadd.s32 4294967294, %v1099_v33  ;;  %v494_v12 = vmul.f32 -0.001358992, %v493_v61  ;;  %v501_v18 = vmul.f32 -0.00019511016, %v493_v61  ;;  %vm826_vm12 = vcmp.eq.s32.totalorder %v824_v48, 0 }
 0x10f   :  { %vm2108_vm11 = vcmp.le.f32.partialorder %v2156_v42, 0.7853982  ;;  %v828_v23 = vsel %vm826_vm12, %v2035_v56, %v827_v31  ;;  %vm829_vm13 = vcmp.eq.s32.totalorder %v824_v48, 2  ;;  %v1118_v32 = vsel %vm995_vm4, %v1117_v13, %v2080_v6 }
 0x110   :  { %vm1383_vm3 = vcmp.lt.s32.totalorder %v1382_v36, 0  ;;  %v495_v15 = vadd.f32 0.041655596, %v494_v12  ;;  %v502_v39 = vadd.f32 0.008332121, %v501_v18  ;;  %vm825_vm7 = vcmp.lt.s32.totalorder %v824_v48, 2 }
 0x111   :  { %v1102_v43 = vsel %vm1383_vm3, 0, %v1382_v36  ;;  %v1120_v18 = vsel %vm2108_vm11, 0, %v1118_v32  ;;  %vm1342_vm12 = vcmask 916480  }
 0x112   :  { %v1103_v17 = vsub.s32 32, %v1102_v43  ;;  %v1107_v0 = vsub.s32 4294967266, %v1102_v43  ;;  %v496_v62 = vmul.f32 %v495_v15, %v493_v61  ;;  %v503_v38 = vmul.f32 %v502_v39, %v493_v61 }
 0x113   :  { %v1104_v46 = vshll.u32 %v1095_v1, %v1102_v43  ;;  %v1137_v6 = vadd.s32 3, %v1120_v18 }
 0x114   :  { %v1105_v57 = vshrl.u32 %v1087_v53, %v1103_v17  ;;  %v1108_v11 = vadd.s32 127, %v1107_v0  ;;  %v497_v27 = vadd.f32 -0.4999988, %v496_v62  ;;  %v504_v54 = vadd.f32 -0.16666654, %v503_v38 }
 0x115   :  { %v1138_v0 = vand.u32 3, %v1137_v6 }
 0x116   :  { %v1106_v55 = vor.u32 %v1105_v57, %v1104_v46  ;;  %v1109_v2 = vshll.u32 %v1108_v11, 23  ;;  %v498_v7 = vmul.f32 %v497_v27, %v493_v61  ;;  %v505_v5 = vmul.f32 %v504_v54, %v493_v61 }
 0x117   :  { %v831_v61 = vsel %vm829_vm13, %v830_v34, %v2043_v63  ;;  %v1292_v34 = vand.u32 3, %v1120_v18  ;;  %vm1139_vm3 = vcmp.lt.s32.totalorder %v1138_v0, 2 }
 0x118   :  { %v1110_v52 = vor.u32 4788187, %v1109_v2  ;;  %v499_v59 = vadd.f32 1.0, %v498_v7  ;;  %v506_v47 = vadd.f32 1.0, %v505_v5  ;;  %v1113_v10 = vcvt.s32.f32 %v1106_v55 }
 0x119   :  { %v832_v12 = vsel %vm825_vm7, %v828_v23, %v831_v61  ;;  %vm1293_vm14 = vcmp.lt.s32.totalorder %v1292_v34, 2  ;;  %vm1294_vm2 = vcmp.eq.s32.totalorder %v1292_v34, 0 }
 0x11a   :  { %v1111_v35 = vand.u32 2147483647, %v1110_v52  ;;  %v507_v28 = vmul.f32 %v506_v47, %v491_v16  ;;  %v516_v14 = vxor.u32 2147483648, %v499_v59  ;;  %v833_v15 = vsel %vm822_vm1, nan, %v832_v12 }
 0x11b   :  { %vm1297_vm1 = vcmp.eq.s32.totalorder %v1292_v34, 2 }
 0x11c   :  { %v1114_v4 = vmul.f32 %v1113_v10, %v1111_v35  ;;  %v513_v22 = vxor.u32 2147483648, %v507_v28  ;;  %v671_v41 = vsel %vm669_vm10, %v516_v14, %v507_v28  ;;  %v517_v37 = vsel %vm515_vm6, %v516_v14, %v507_v28 }
 0x11d   :  { %vm1332_vm10 = vcmask 261120   ;;  %vm1338_vm6 = vcmask 654336  }
 0x11e   :  { %v1115_v60 = vxor.u32 2147483648, %v1114_v4  ;;  %v668_v30 = vsel %vm666_vm9, %v499_v59, %v513_v22  ;;  %v514_v1 = vsel %vm512_vm0, %v499_v59, %v513_v22  ;;  %vm1330_vm9 = vcmask 130048  }
 0x11f   :  { %v672_v29 = vsel %vm665_vm8, %v668_v30, %v671_v41  ;;  %v518_v21 = vsel %vm511_vm15, %v514_v1, %v517_v37  ;;  %vm1136_vm8 = vweird.f32 %v1543_v25  ;;  %vm1334_vm15 = vcmask 392192  }
 0x120   :  { %v1116_v50 = vsel %vm995_vm4, %v1115_v60, %v1114_v4  ;;  %v673_v19 = vsel %vm508_vm5, nan, %v672_v29  ;;  %v519_v58 = vsel %vm508_vm5, nan, %v518_v21  ;;  %vm1140_vm4 = vcmp.eq.s32.totalorder %v1138_v0, 0 }
 0x121   :  { %v1119_v26 = vsel %vm2108_vm11, %v1543_v25, %v1116_v50  ;;  %1311 = vrot.lane.b32.xlu1 %v673_v19, %s1505_s19  ;;  %1307 = vrot.lane.b32.xlu2 %v519_v58, %s1506_s20  ;;  %vm1143_vm5 = vcmp.eq.s32.totalorder %v1138_v0, 2  ;;  %vm1336_vm0 = vcmask 523264   ;;  %vm1340_vm11 = vcmask 785408  }
 0x122   :  { %v1121_v9 = vmul.f32 %v1119_v26, %v1119_v26 }
 0x124   :  { %v1122_v33 = vmul.f32 -0.001358992, %v1121_v9  ;;  %v1129_v16 = vmul.f32 -0.00019511016, %v1121_v9 }
 0x126   :  { %v1123_v36 = vadd.f32 0.041655596, %v1122_v33  ;;  %v1130_v24 = vadd.f32 0.008332121, %v1129_v16 }
 0x128   :  { %v1124_v43 = vmul.f32 %v1123_v36, %v1121_v9  ;;  %v1131_v31 = vmul.f32 %v1130_v24, %v1121_v9 }
 0x129   :  { %1315 = vrot.lane.b32.xlu2 %v833_v15, %s1507_s21 }
 0x12a   :  { %v1125_v39 = vadd.f32 -0.4999988, %v1124_v43  ;;  %v1132_v53 = vadd.f32 -0.16666654, %v1131_v31 }
 0x12c   :  { %v1126_v17 = vmul.f32 %v1125_v39, %v1121_v9  ;;  %v1133_v44 = vmul.f32 %v1132_v53, %v1121_v9 }
 0x12e   :  { %v1127_v56 = vadd.f32 1.0, %v1126_v17  ;;  %v1134_v63 = vadd.f32 1.0, %v1133_v44 }
 0x130   :  { %v1135_v62 = vmul.f32 %v1134_v63, %v1119_v26  ;;  %v1144_v38 = vxor.u32 2147483648, %v1127_v56 }
 0x132   :  { %v1141_v57 = vxor.u32 2147483648, %v1135_v62  ;;  %v1145_v46 = vsel %vm1143_vm5, %v1144_v38, %v1135_v62  ;;  %v1299_v27 = vsel %vm1297_vm1, %v1144_v38, %v1135_v62 }
 0x134   :  { %v1142_v8 = vsel %vm1140_vm4, %v1127_v56, %v1141_v57  ;;  %v1296_v11 = vsel %vm1294_vm2, %v1127_v56, %v1141_v57 }
 0x135   :  { %v1146_v54 = vsel %vm1139_vm3, %v1142_v8, %v1145_v46  ;;  %v1300_v20 = vsel %vm1293_vm14, %v1296_v11, %v1299_v27 }
 0x136   :  { %v1147_v55 = vsel %vm1136_vm8, nan, %v1146_v54  ;;  %v1301_v2 = vsel %vm1136_vm8, nan, %v1300_v20 }
 0x137   :  { %1323 = vrot.lane.b32.xlu1 %v1147_v55, %s1508_s22  ;;  %1327 = vrot.lane.b32.xlu2 %v1301_v2, %s1509_s23 }
 0x164   :  { %v1304_v7 = vpop.permute.xlu2 %1303 }
 0x165   :  { %v1331_v59 = vsel %vm1330_vm9, %v2085_v51, %v1304_v7 }
 0x16b   :  { %v1320_v35 = vpop.permute.xlu0 %1319 }
 0x17b   :  { %v1308_v5 = vpop.permute.xlu2 %1307 }
 0x17c   :  { %v1333_v47 = vsel %vm1332_vm10, %v1331_v59, %v1308_v5 }
 0x183   :  { %v1316_v52 = vpop.permute.xlu2 %1315 }
 0x191   :  { %v1328_v28 = vpop.permute.xlu2 %1327 }
 0x193   :  { %v1312_v3 = vpop.permute.xlu1 %1311 }
 0x194   :  { %v1335_v25 = vsel %vm1334_vm15, %v1333_v47, %v1312_v3 }
 0x195   :  { %v1337_v40 = vsel %vm1336_vm0, %v1335_v25, %v1316_v52 }
 0x196   :  { %v1339_v45 = vsel %vm1338_vm6, %v1337_v40, %v1320_v35 }
 0x1a9   :  { %v1324_v10 = vpop.permute.xlu1 %1323 }
 0x1aa   :  { %v1341_v14 = vsel %vm1340_vm11, %v1339_v45, %v1324_v10 }
 0x1ab   :  { %v1343_v51 = vsel %vm1342_vm12, %v1341_v14, %v1328_v28 }
 0x1ac   :  { %1344 = vst [vmem:[#allocation7] sm:$0x3] %v1343_v51 }
 0x1ad   :  { %1355 = dma.vmem_to_hbm [thread:$0]  %s1351_s25, 32, %s1353_s28, [#allocation4]  }
 0x1ae   :  { %1489 = dma.done.wait [#allocation4], 32  }
 0x1af   :  { %1490 = vsyncadd [#allocation4], 4294967264 }
 0x1b0   :  { %1360 = vsyncpa [#allocation3], 1 }
 0x1b1   :  { %1361 = vsyncpa [#allocation6], 1 }
 0x1b2   :  { %1362 = vsyncpa [#allocation4], 1 }

</bundles_post_ra>
